<compile_context>
chip_gen: v7x
topology: tpu7x:2x2x1
jax: 0.10.0
libtpu: 0.0.40
codegen_flags: <defaults>
</compile_context>

<pallas_src>
import functools

import jax
import jax.numpy as jnp
from jax import lax
from jax.experimental import pallas as pl
from jax.experimental.pallas import tpu as pltpu


# ----------------------------------------------------------------------------
# Kernel: fused bilinear x2 upsample + 3x3 conv (pad 1) + bias + ReLU
# ----------------------------------------------------------------------------
def _fused_upsample_conv_kernel(x_ref, w_ref, b_ref, o_ref, up_ref, *maybe_col,
                                th_in, W, Cin, use_im2col):
    """One grid step = (batch b, output-row-tile t).

    x_ref : (Cin, th_in+2, W+2)   f32  edge-padded small-input rows (1 halo row/side)
    w_ref : (Cout, 9*Cin)         bf16 conv weights, K index = (ky*3+kx)*Cin + ci
    b_ref : (Cout, 1)             f32  bias
    o_ref : (Cout, th_out*Wout)   f32  output tile, spatial flattened (lane-dense)
    up_ref: VMEM (Cin, th_out+2, Wout+2) f32  zero-bordered upsampled tile (scratch)
    maybe_col: optional VMEM (9*Cin, th_out*Wout) f32 im2col slab (small-Cin path only)
    """
    th_out = 2 * th_in
    Wout = 2 * W
    M = th_out * Wout

    t = pl.program_id(1)
    nt = pl.num_programs(1)

    xt = x_ref[...]                     # (Cin, th_in+2, W+2), replicate-padded rows/cols

    # ---- bilinear x2 along W (fixed 0.25/0.75 taps; replicate pad == PyTorch edge clamp) ----
    a = xt[:, :, 0:W]                   # original col j-1
    c = xt[:, :, 1:W + 1]               # original col j
    d = xt[:, :, 2:W + 2]               # original col j+1
    even_c = 0.25 * a + 0.75 * c        # upsampled col 2j
    odd_c = 0.75 * c + 0.25 * d         # upsampled col 2j+1
    # TODO(synk): replace this lane interleave (and the row interleave below) with
    # pltpu.pack_elementwise / strided sublane stores once verified on all target gens.
    xtc = jnp.stack([even_c, odd_c], axis=-1).reshape(Cin, th_in + 2, Wout)

    # ---- bilinear x2 along H ----
    ra = xtc[:, 0:th_in, :]             # original row i-1
    rb = xtc[:, 1:th_in + 1, :]         # original row i
    rc = xtc[:, 2:th_in + 2, :]         # original row i+1
    even_r = 0.25 * ra + 0.75 * rb      # upsampled row 2i
    odd_r = 0.75 * rb + 0.25 * rc       # upsampled row 2i+1
    main = jnp.stack([even_r, odd_r], axis=2).reshape(Cin, th_out, Wout)

    # Conv halo rows: the real upsampled rows just above/below this tile,
    # zeroed at the true image borders (conv zero-padding).
    top = 0.75 * xtc[:, 0:1, :] + 0.25 * xtc[:, 1:2, :]
    bot = 0.25 * xtc[:, th_in:th_in + 1, :] + 0.75 * xtc[:, th_in + 1:th_in + 2, :]
    top = top * jnp.where(t > 0, 1.0, 0.0).astype(jnp.float32)
    bot = bot * jnp.where(t < nt - 1, 1.0, 0.0).astype(jnp.float32)

    # ---- assemble the zero-padded upsampled tile in VMEM (never goes to HBM) ----
    # Only the left/right border columns need explicit zeros: every other element of the
    # scratch is rewritten below each step, so no full-scratch zeroing.
    up_ref[:, :, 0:1] = jnp.zeros((Cin, th_out + 2, 1), jnp.float32)
    up_ref[:, :, Wout + 1:Wout + 2] = jnp.zeros((Cin, th_out + 2, 1), jnp.float32)
    up_ref[:, 1:th_out + 1, 1:Wout + 1] = main
    up_ref[:, 0:1, 1:Wout + 1] = top
    up_ref[:, th_out + 1:th_out + 2, 1:Wout + 1] = bot

    if use_im2col:
        # Small Cin: build a (9*Cin, M) slab so the MXU sees one K=9*Cin matmul.
        col_ref = maybe_col[0]
        for ky in range(3):
            for kx in range(3):
                tap = ky * 3 + kx
                patch = up_ref[:, ky:ky + th_out, kx:kx + Wout]        # (Cin, th_out, Wout)
                col_ref[tap * Cin:(tap + 1) * Cin, :] = patch.reshape(Cin, M)
        # bf16 operands -> native single-pass MXU matmul; f32 accumulation.
        # TODO(synk): keep the slab itself in bf16 once unaligned packed sublane stores are
        # verified on all target generations (halves slab VMEM + im2col traffic).
        acc = jnp.dot(w_ref[...], col_ref[...].astype(jnp.bfloat16),
                      preferred_element_type=jnp.float32)              # (Cout, M)
    else:
        # Large Cin (9*Cin >= 128): skip the im2col slab entirely and accumulate 9 per-tap
        # matmuls straight from up_ref views (saves 9*Cin*M stores+reloads and the slab VMEM).
        acc = None
        for ky in range(3):
            for kx in range(3):
                tap = ky * 3 + kx
                patch = up_ref[:, ky:ky + th_out, kx:kx + Wout].reshape(Cin, M)
                part = jnp.dot(w_ref[:, tap * Cin:(tap + 1) * Cin],
                               patch.astype(jnp.bfloat16),
                               preferred_element_type=jnp.float32)
                acc = part if acc is None else acc + part

    o_ref[...] = jnp.maximum(acc + b_ref[...], 0.0)     # bias + ReLU (f32, no cast)


# ----------------------------------------------------------------------------
# VMEM sizing helpers (generation-aware)
# ----------------------------------------------------------------------------
def _vmem_capacity_bytes():
    try:
        info = pltpu.get_tpu_info()
        for name in ("vmem_capacity_bytes", "vmem_size_bytes", "vmem_bytes"):
            v = getattr(info, name, None)
            if v:
                return int(v)
    except Exception:
        pass
    return 64 * 1024 * 1024   # conservative fallback: v7x per-TensorCore VMEM


def _vmem_need_bytes(th, W, Cin, Cout, use_im2col):
    Wout = 2 * W
    M = 2 * th * Wout
    need = 4 * (2 * Cout * M                              # double-buffered output block
                + Cout * M                                # f32 matmul result / epilogue temp
                + Cin * (2 * th + 2) * (Wout + 2)         # upsampled scratch
                + 2 * Cin * (th + 2) * (W + 2))           # double-buffered input block
    if use_im2col:
        need += 4 * 9 * Cin * M                           # f32 im2col slab
    need += 2 * Cout * 9 * Cin + 4 * Cout                 # bf16 weights + f32 bias
    return need


def _pick_row_tile(N, H, W, Cin, Cout, vmem_budget_bytes):
    """Largest divisor of H whose output tile is lane-dense (2*th*Wout % 128 == 0, or the
    whole image) and fits the VMEM budget; prefers >=2 grid steps when batch == 1 so both
    v7x TensorCores get work."""
    use_im2col = (9 * Cin) < 128
    cands = []
    for th in range(1, H + 1):
        if H % th:
            continue
        M = 4 * th * W
        if (M % 128 != 0) and (th != H):
            continue
        if _vmem_need_bytes(th, W, Cin, Cout, use_im2col) <= vmem_budget_bytes:
            cands.append(th)
    if not cands:
        # TODO(synk): add column tiling for images too large for the VMEM budget.
        return H
    best = max(cands)
    if N == 1 and best == H:
        smaller = [c for c in cands if c < H]
        if smaller:
            best = max(smaller)
    return best


# ----------------------------------------------------------------------------
# Wrapper: Upsample_block_normal.forward (NCHW in, NCHW out)
# ----------------------------------------------------------------------------
def upsample_block_normal_forward(x_nchw, weight_oihw, bias, *, row_tile=None):
    N, Cin, H, W = x_nchw.shape
    Cout = weight_oihw.shape[0]
    Hout, Wout = 2 * H, 2 * W
    use_im2col = (9 * Cin) < 128

    vmem_cap = _vmem_capacity_bytes()
    tile_budget = (3 * vmem_cap) // 8          # ~48 MiB on v5e/v6e, ~24 MiB on v7x
    th = (_pick_row_tile(N, H, W, Cin, Cout, tile_budget)
          if row_tile is None else int(row_tile))
    if H % th != 0:
        raise ValueError(f"row_tile {th} must divide H={H}")
    T = H // th
    th_out = 2 * th
    M = th_out * Wout
    if (M % 128 != 0) and (T != 1):
        raise ValueError("row tile must give a lane-dense output block")

    x = x_nchw.astype(jnp.float32)
    # Replicate (edge) padding of the SMALL input == PyTorch's align_corners=False source
    # clamping, so the in-kernel x2 upsample is uniform 0.25/0.75 taps with no edge cases.
    xp = jnp.pad(x, ((0, 0), (0, 0), (1, 1), (1, 1)), mode="edge")
    # Window rows per tile (halo of 1 row/side) WITHOUT transposing, so XLA does not
    # materialize a second full copy of the padded input.
    win = jnp.arange(T)[:, None] * th + jnp.arange(th + 2)[None, :]     # (T, th+2)
    xw = xp[:, :, win, :]                                               # (N, Cin, T, th+2, W+2)
    # TODO(synk): replace this windowing entirely with memory_space=pl.ANY + a manual
    # double-buffered make_async_copy of rows pl.ds(t*th, th+2) inside the kernel.

    # weights -> (Cout, 9*Cin) bf16 with K index (ky*3+kx)*Cin + ci ; bias -> (Cout, 1) f32
    w2 = jnp.transpose(weight_oihw.astype(jnp.float32), (0, 2, 3, 1)).reshape(Cout, 9 * Cin)
    w2 = w2.astype(jnp.bfloat16)
    b2 = bias.astype(jnp.float32).reshape(Cout, 1)

    kernel = functools.partial(_fused_upsample_conv_kernel,
                               th_in=th, W=W, Cin=Cin, use_im2col=use_im2col)

    scratch = [pltpu.VMEM((Cin, th_out + 2, Wout + 2), jnp.float32)]
    if use_im2col:
        scratch.append(pltpu.VMEM((9 * Cin, M), jnp.float32))

    need = _vmem_need_bytes(th, W, Cin, Cout, use_im2col)
    vmem_limit = int(min(max(2 * need, 32 * 1024 * 1024), (3 * vmem_cap) // 4))

    out_flat = pl.pallas_call(
        kernel,
        out_shape=jax.ShapeDtypeStruct((N, Cout, Hout * Wout), jnp.float32),
        grid_spec=pltpu.PrefetchScalarGridSpec(
            num_scalar_prefetch=0,
            grid=(N, T),
            in_specs=[
                pl.BlockSpec((None, Cin, None, th + 2, W + 2),
                             lambda b, t: (b, 0, t, 0, 0)),
                pl.BlockSpec((Cout, 9 * Cin), lambda b, t: (0, 0)),
                pl.BlockSpec((Cout, 1), lambda b, t: (0, 0)),
            ],
            out_specs=pl.BlockSpec((None, Cout, M), lambda b, t: (b, 0, t)),
            scratch_shapes=scratch,
        ),
        compiler_params=pltpu.CompilerParams(
            dimension_semantics=("parallel", "parallel"),
            vmem_limit_bytes=vmem_limit),
    )(xw, w2, b2)

    # Free reshape: (N, Cout, Hout*Wout) -> (N, Cout, Hout, Wout); already NCHW.
    return out_flat.reshape(N, Cout, Hout, Wout)


# ----------------------------------------------------------------------------
# Parameter init (xavier_normal_, gain=0.02, zero bias -- as init_weights('xavier'))
# ----------------------------------------------------------------------------
def init_params(key, in_channel, out_channel):
    fan_in = in_channel * 3 * 3
    fan_out = out_channel * 3 * 3
    std = 0.02 * jnp.sqrt(2.0 / (fan_in + fan_out))
    w = jax.random.normal(key, (out_channel, in_channel, 3, 3), jnp.float32) * std
    b = jnp.zeros((out_channel,), jnp.float32)
    return w, b


# ----------------------------------------------------------------------------
# Pure-JAX reference (PyTorch semantics) for the correctness check
# ----------------------------------------------------------------------------
def _bilinear_x2_reference(x_nchw):
    n, c, h, w = x_nchw.shape

    def idx_weights(size):
        src = (jnp.arange(2 * size, dtype=jnp.float32) + 0.5) / 2.0 - 0.5
        src = jnp.maximum(src, 0.0)             # PyTorch clamps negative source coords
        i0 = jnp.floor(src).astype(jnp.int32)
        frac = src - i0.astype(jnp.float32)
        i0 = jnp.clip(i0, 0, size - 1)
        i1 = jnp.clip(i0 + 1, 0, size - 1)
        return i0, i1, frac

    y0, y1, fy = idx_weights(h)
    x0, x1, fx = idx_weights(w)
    rows = (x_nchw[:, :, y0, :] * (1.0 - fy)[None, None, :, None]
            + x_nchw[:, :, y1, :] * fy[None, None, :, None])
    return rows[:, :, :, x0] * (1.0 - fx) + rows[:, :, :, x1] * fx


def _reference_forward(x, weight, bias):
    up = _bilinear_x2_reference(x.astype(jnp.float32))
    out = lax.conv_general_dilated(
        up, weight.astype(jnp.float32), window_strides=(1, 1), padding="SAME",
        dimension_numbers=("NCHW", "OIHW", "NCHW"))
    return jnp.maximum(out + bias[None, :, None, None], 0.0)


if __name__ == "__main__":
    key = jax.random.PRNGKey(0)
    configs = [
        # (N, Cin, H, W, Cout, row_tile)  -- first exercises multi-tile + halo path
        (2, 3, 8, 8, 16, 4),
        # odd sizes, single whole-image tile (auto-picked)
        (1, 4, 6, 10, 32, None),
    ]
    for (N, Cin, H, W, Cout, row_tile) in configs:
        key, kx, kw, kb = jax.random.split(key, 4)
        x = jax.random.normal(kx, (N, Cin, H, W), jnp.float32)
        weight, bias = init_params(kw, Cin, Cout)
        bias = 0.05 * jax.random.normal(kb, (Cout,), jnp.float32)  # nonzero to test bias path

        fwd = jax.jit(functools.partial(upsample_block_normal_forward, row_tile=row_tile))
        out = jax.block_until_ready(fwd(x, weight, bias))

        ref = _reference_forward(x, weight, bias)
        assert out.shape == (N, Cout, 2 * H, 2 * W), out.shape
        max_err = float(jnp.max(jnp.abs(out - ref)))
        # bf16 MXU operands (f32 accumulation) -> loosened tolerance vs. the f32 reference.
        assert jnp.allclose(out, ref, atol=2e-3, rtol=2e-2), max_err

    print("KERNEL_OK")
</pallas_src>

<mosaic_0001>
module attributes {stable_mosaic.version = 11 : i64} {
  func.func @_fused_upsample_conv_kernel(%arg0: i32, %arg1: i32, %arg2: memref<1x3x1x6x10xf32, #tpu.memory_space<vmem>>, %arg3: memref<16x27xbf16, #tpu.memory_space<vmem>>, %arg4: memref<16x1xf32, #tpu.memory_space<vmem>>, %arg5: memref<1x16x128xf32, #tpu.memory_space<vmem>>, %arg6: memref<3x10x18xf32, #tpu.memory_space<vmem>>, %arg7: memref<27x128xf32, #tpu.memory_space<vmem>>) attributes {dimension_semantics = [#tpu.dimension_semantics<parallel>, #tpu.dimension_semantics<parallel>], iteration_bounds = array<i64: 2, 2>, scalar_prefetch = 0 : i64, scratch_operands = 2 : i64, tpu.core_type = #tpu.core_type<tc>, window_params = [{transform_indices = @transform_0, window_bounds = array<i64: 1, 3, 1, 6, 10>}, {pipeline_mode = #tpu.pipeline_mode<synchronous>, transform_indices = @transform_1, window_bounds = array<i64: 16, 27>}, {pipeline_mode = #tpu.pipeline_mode<synchronous>, transform_indices = @transform_2, window_bounds = array<i64: 16, 1>}, {transform_indices = @transform_3, window_bounds = array<i64: 1, 16, 128>}]} {
    %c0 = arith.constant 0 : index
    %c0_0 = arith.constant 0 : index
    %c0_1 = arith.constant 0 : index
    %c0_2 = arith.constant 0 : index
    %c0_3 = arith.constant 0 : index
    %0 = vector.load %arg2[%c0, %c0_0, %c0_1, %c0_2, %c0_3] : memref<1x3x1x6x10xf32, #tpu.memory_space<vmem>>, vector<1x3x1x6x10xf32>
    %1 = vector.shape_cast %0 : vector<1x3x1x6x10xf32> to vector<3x6x10xf32>
    %2 = vector.extract_strided_slice %1 {offsets = [0, 0, 0], sizes = [3, 6, 8], strides = [1, 1, 1]} : vector<3x6x10xf32> to vector<3x6x8xf32>
    %3 = vector.extract_strided_slice %1 {offsets = [0, 0, 1], sizes = [3, 6, 8], strides = [1, 1, 1]} : vector<3x6x10xf32> to vector<3x6x8xf32>
    %4 = vector.extract_strided_slice %1 {offsets = [0, 0, 2], sizes = [3, 6, 8], strides = [1, 1, 1]} : vector<3x6x10xf32> to vector<3x6x8xf32>
    %cst = arith.constant 2.500000e-01 : f32
    %5 = vector.broadcast %cst : f32 to vector<3x6x8xf32>
    %6 = arith.mulf %5, %2 : vector<3x6x8xf32>
    %cst_4 = arith.constant 7.500000e-01 : f32
    %7 = vector.broadcast %cst_4 : f32 to vector<3x6x8xf32>
    %8 = arith.mulf %7, %3 : vector<3x6x8xf32>
    %9 = arith.addf %6, %8 : vector<3x6x8xf32>
    %cst_5 = arith.constant 7.500000e-01 : f32
    %10 = vector.broadcast %cst_5 : f32 to vector<3x6x8xf32>
    %11 = arith.mulf %10, %3 : vector<3x6x8xf32>
    %cst_6 = arith.constant 2.500000e-01 : f32
    %12 = vector.broadcast %cst_6 : f32 to vector<3x6x8xf32>
    %13 = arith.mulf %12, %4 : vector<3x6x8xf32>
    %14 = arith.addf %11, %13 : vector<3x6x8xf32>
    %15 = vector.shape_cast %9 : vector<3x6x8xf32> to vector<3x6x8x1xf32>
    %16 = vector.shape_cast %14 : vector<3x6x8xf32> to vector<3x6x8x1xf32>
    %17 = tpu.concatenate %15, %16 in 3 : vector<3x6x8x1xf32>, vector<3x6x8x1xf32> -> vector<3x6x8x2xf32>
    %18 = vector.shape_cast %17 : vector<3x6x8x2xf32> to vector<3x6x16xf32>
    %19 = vector.extract_strided_slice %18 {offsets = [0, 0, 0], sizes = [3, 4, 16], strides = [1, 1, 1]} : vector<3x6x16xf32> to vector<3x4x16xf32>
    %20 = vector.extract_strided_slice %18 {offsets = [0, 1, 0], sizes = [3, 4, 16], strides = [1, 1, 1]} : vector<3x6x16xf32> to vector<3x4x16xf32>
    %21 = vector.extract_strided_slice %18 {offsets = [0, 2, 0], sizes = [3, 4, 16], strides = [1, 1, 1]} : vector<3x6x16xf32> to vector<3x4x16xf32>
    %cst_7 = arith.constant 2.500000e-01 : f32
    %22 = vector.broadcast %cst_7 : f32 to vector<3x4x16xf32>
    %23 = arith.mulf %22, %19 : vector<3x4x16xf32>
    %cst_8 = arith.constant 7.500000e-01 : f32
    %24 = vector.broadcast %cst_8 : f32 to vector<3x4x16xf32>
    %25 = arith.mulf %24, %20 : vector<3x4x16xf32>
    %26 = arith.addf %23, %25 : vector<3x4x16xf32>
    %cst_9 = arith.constant 7.500000e-01 : f32
    %27 = vector.broadcast %cst_9 : f32 to vector<3x4x16xf32>
    %28 = arith.mulf %27, %20 : vector<3x4x16xf32>
    %cst_10 = arith.constant 2.500000e-01 : f32
    %29 = vector.broadcast %cst_10 : f32 to vector<3x4x16xf32>
    %30 = arith.mulf %29, %21 : vector<3x4x16xf32>
    %31 = arith.addf %28, %30 : vector<3x4x16xf32>
    %32 = vector.shape_cast %26 : vector<3x4x16xf32> to vector<3x4x1x16xf32>
    %33 = vector.shape_cast %31 : vector<3x4x16xf32> to vector<3x4x1x16xf32>
    %34 = tpu.concatenate %32, %33 in 2 : vector<3x4x1x16xf32>, vector<3x4x1x16xf32> -> vector<3x4x2x16xf32>
    %35 = vector.shape_cast %34 : vector<3x4x2x16xf32> to vector<3x8x16xf32>
    %36 = vector.extract_strided_slice %18 {offsets = [0, 0, 0], sizes = [3, 1, 16], strides = [1, 1, 1]} : vector<3x6x16xf32> to vector<3x1x16xf32>
    %cst_11 = arith.constant 7.500000e-01 : f32
    %37 = vector.broadcast %cst_11 : f32 to vector<3x1x16xf32>
    %38 = arith.mulf %37, %36 : vector<3x1x16xf32>
    %39 = vector.extract_strided_slice %18 {offsets = [0, 1, 0], sizes = [3, 1, 16], strides = [1, 1, 1]} : vector<3x6x16xf32> to vector<3x1x16xf32>
    %cst_12 = arith.constant 2.500000e-01 : f32
    %40 = vector.broadcast %cst_12 : f32 to vector<3x1x16xf32>
    %41 = arith.mulf %40, %39 : vector<3x1x16xf32>
    %42 = arith.addf %38, %41 : vector<3x1x16xf32>
    %43 = vector.extract_strided_slice %18 {offsets = [0, 4, 0], sizes = [3, 1, 16], strides = [1, 1, 1]} : vector<3x6x16xf32> to vector<3x1x16xf32>
    %cst_13 = arith.constant 2.500000e-01 : f32
    %44 = vector.broadcast %cst_13 : f32 to vector<3x1x16xf32>
    %45 = arith.mulf %44, %43 : vector<3x1x16xf32>
    %46 = vector.extract_strided_slice %18 {offsets = [0, 5, 0], sizes = [3, 1, 16], strides = [1, 1, 1]} : vector<3x6x16xf32> to vector<3x1x16xf32>
    %cst_14 = arith.constant 7.500000e-01 : f32
    %47 = vector.broadcast %cst_14 : f32 to vector<3x1x16xf32>
    %48 = arith.mulf %47, %46 : vector<3x1x16xf32>
    %49 = arith.addf %45, %48 : vector<3x1x16xf32>
    %c0_i32 = arith.constant 0 : i32
    %50 = arith.cmpi sgt, %arg1, %c0_i32 : i32
    %cst_15 = arith.constant 1.000000e+00 : f32
    %cst_16 = arith.constant 0.000000e+00 : f32
    %51 = arith.select %50, %cst_15, %cst_16 : f32
    %52 = vector.broadcast %51 : f32 to vector<3x1x16xf32>
    %53 = arith.mulf %42, %52 : vector<3x1x16xf32>
    %c1_i32 = arith.constant 1 : i32
    %54 = arith.cmpi slt, %arg1, %c1_i32 : i32
    %cst_17 = arith.constant 1.000000e+00 : f32
    %cst_18 = arith.constant 0.000000e+00 : f32
    %55 = arith.select %54, %cst_17, %cst_18 : f32
    %56 = vector.broadcast %55 : f32 to vector<3x1x16xf32>
    %57 = arith.mulf %49, %56 : vector<3x1x16xf32>
    %cst_19 = arith.constant 0.000000e+00 : f32
    %58 = vector.broadcast %cst_19 : f32 to vector<3x10x1xf32>
    %c0_20 = arith.constant 0 : index
    %c0_21 = arith.constant 0 : index
    %c0_22 = arith.constant 0 : index
    %59 = vector.load %arg6[%c0_20, %c0_21, %c0_22] : memref<3x10x18xf32, #tpu.memory_space<vmem>>, vector<3x10x1xf32>
    tpu.vector_store %arg6[%c0_20, %c0_21, %c0_22], %58 {strides = array<i32>} : memref<3x10x18xf32, #tpu.memory_space<vmem>>, vector<3x10x1xf32>,
    %cst_23 = arith.constant 0.000000e+00 : f32
    %60 = vector.broadcast %cst_23 : f32 to vector<3x10x1xf32>
    %c0_24 = arith.constant 0 : index
    %c0_25 = arith.constant 0 : index
    %c17 = arith.constant 17 : index
    %61 = vector.load %arg6[%c0_24, %c0_25, %c17] : memref<3x10x18xf32, #tpu.memory_space<vmem>>, vector<3x10x1xf32>
    tpu.vector_store %arg6[%c0_24, %c0_25, %c17], %60 {strides = array<i32>} : memref<3x10x18xf32, #tpu.memory_space<vmem>>, vector<3x10x1xf32>,
    %c0_26 = arith.constant 0 : index
    %c1 = arith.constant 1 : index
    %c1_27 = arith.constant 1 : index
    %62 = vector.load %arg6[%c0_26, %c1, %c1_27] : memref<3x10x18xf32, #tpu.memory_space<vmem>>, vector<3x8x16xf32>
    tpu.vector_store %arg6[%c0_26, %c1, %c1_27], %35 {strides = array<i32>} : memref<3x10x18xf32, #tpu.memory_space<vmem>>, vector<3x8x16xf32>,
    %c0_28 = arith.constant 0 : index
    %c0_29 = arith.constant 0 : index
    %c1_30 = arith.constant 1 : index
    %63 = vector.load %arg6[%c0_28, %c0_29, %c1_30] : memref<3x10x18xf32, #tpu.memory_space<vmem>>, vector<3x1x16xf32>
    tpu.vector_store %arg6[%c0_28, %c0_29, %c1_30], %53 {strides = array<i32>} : memref<3x10x18xf32, #tpu.memory_space<vmem>>, vector<3x1x16xf32>,
    %c0_31 = arith.constant 0 : index
    %c9 = arith.constant 9 : index
    %c1_32 = arith.constant 1 : index
    %64 = vector.load %arg6[%c0_31, %c9, %c1_32] : memref<3x10x18xf32, #tpu.memory_space<vmem>>, vector<3x1x16xf32>
    tpu.vector_store %arg6[%c0_31, %c9, %c1_32], %57 {strides = array<i32>} : memref<3x10x18xf32, #tpu.memory_space<vmem>>, vector<3x1x16xf32>,
    %c0_33 = arith.constant 0 : index
    %c0_34 = arith.constant 0 : index
    %c0_35 = arith.constant 0 : index
    %65 = vector.load %arg6[%c0_33, %c0_34, %c0_35] : memref<3x10x18xf32, #tpu.memory_space<vmem>>, vector<3x8x16xf32>
    %66 = vector.shape_cast %65 : vector<3x8x16xf32> to vector<3x128xf32>
    %c0_36 = arith.constant 0 : index
    %c0_37 = arith.constant 0 : index
    %67 = vector.load %arg7[%c0_36, %c0_37] : memref<27x128xf32, #tpu.memory_space<vmem>>, vector<3x128xf32>
    tpu.vector_store %arg7[%c0_36, %c0_37], %66 {strides = array<i32>} : memref<27x128xf32, #tpu.memory_space<vmem>>, vector<3x128xf32>,
    %c0_38 = arith.constant 0 : index
    %c0_39 = arith.constant 0 : index
    %c1_40 = arith.constant 1 : index
    %68 = vector.load %arg6[%c0_38, %c0_39, %c1_40] : memref<3x10x18xf32, #tpu.memory_space<vmem>>, vector<3x8x16xf32>
    %69 = vector.shape_cast %68 : vector<3x8x16xf32> to vector<3x128xf32>
    %c3 = arith.constant 3 : index
    %c0_41 = arith.constant 0 : index
    %70 = vector.load %arg7[%c3, %c0_41] : memref<27x128xf32, #tpu.memory_space<vmem>>, vector<3x128xf32>
    tpu.vector_store %arg7[%c3, %c0_41], %69 {strides = array<i32>} : memref<27x128xf32, #tpu.memory_space<vmem>>, vector<3x128xf32>,
    %c0_42 = arith.constant 0 : index
    %c0_43 = arith.constant 0 : index
    %c2 = arith.constant 2 : index
    %71 = vector.load %arg6[%c0_42, %c0_43, %c2] : memref<3x10x18xf32, #tpu.memory_space<vmem>>, vector<3x8x16xf32>
    %72 = vector.shape_cast %71 : vector<3x8x16xf32> to vector<3x128xf32>
    %c6 = arith.constant 6 : index
    %c0_44 = arith.constant 0 : index
    %73 = vector.load %arg7[%c6, %c0_44] : memref<27x128xf32, #tpu.memory_space<vmem>>, vector<3x128xf32>
    tpu.vector_store %arg7[%c6, %c0_44], %72 {strides = array<i32>} : memref<27x128xf32, #tpu.memory_space<vmem>>, vector<3x128xf32>,
    %c0_45 = arith.constant 0 : index
    %c1_46 = arith.constant 1 : index
    %c0_47 = arith.constant 0 : index
    %74 = vector.load %arg6[%c0_45, %c1_46, %c0_47] : memref<3x10x18xf32, #tpu.memory_space<vmem>>, vector<3x8x16xf32>
    %75 = vector.shape_cast %74 : vector<3x8x16xf32> to vector<3x128xf32>
    %c9_48 = arith.constant 9 : index
    %c0_49 = arith.constant 0 : index
    %76 = vector.load %arg7[%c9_48, %c0_49] : memref<27x128xf32, #tpu.memory_space<vmem>>, vector<3x128xf32>
    tpu.vector_store %arg7[%c9_48, %c0_49], %75 {strides = array<i32>} : memref<27x128xf32, #tpu.memory_space<vmem>>, vector<3x128xf32>,
    %c0_50 = arith.constant 0 : index
    %c1_51 = arith.constant 1 : index
    %c1_52 = arith.constant 1 : index
    %77 = vector.load %arg6[%c0_50, %c1_51, %c1_52] : memref<3x10x18xf32, #tpu.memory_space<vmem>>, vector<3x8x16xf32>
    %78 = vector.shape_cast %77 : vector<3x8x16xf32> to vector<3x128xf32>
    %c12 = arith.constant 12 : index
    %c0_53 = arith.constant 0 : index
    %79 = vector.load %arg7[%c12, %c0_53] : memref<27x128xf32, #tpu.memory_space<vmem>>, vector<3x128xf32>
    tpu.vector_store %arg7[%c12, %c0_53], %78 {strides = array<i32>} : memref<27x128xf32, #tpu.memory_space<vmem>>, vector<3x128xf32>,
    %c0_54 = arith.constant 0 : index
    %c1_55 = arith.constant 1 : index
    %c2_56 = arith.constant 2 : index
    %80 = vector.load %arg6[%c0_54, %c1_55, %c2_56] : memref<3x10x18xf32, #tpu.memory_space<vmem>>, vector<3x8x16xf32>
    %81 = vector.shape_cast %80 : vector<3x8x16xf32> to vector<3x128xf32>
    %c15 = arith.constant 15 : index
    %c0_57 = arith.constant 0 : index
    %82 = vector.load %arg7[%c15, %c0_57] : memref<27x128xf32, #tpu.memory_space<vmem>>, vector<3x128xf32>
    tpu.vector_store %arg7[%c15, %c0_57], %81 {strides = array<i32>} : memref<27x128xf32, #tpu.memory_space<vmem>>, vector<3x128xf32>,
    %c0_58 = arith.constant 0 : index
    %c2_59 = arith.constant 2 : index
    %c0_60 = arith.constant 0 : index
    %83 = vector.load %arg6[%c0_58, %c2_59, %c0_60] : memref<3x10x18xf32, #tpu.memory_space<vmem>>, vector<3x8x16xf32>
    %84 = vector.shape_cast %83 : vector<3x8x16xf32> to vector<3x128xf32>
    %c18 = arith.constant 18 : index
    %c0_61 = arith.constant 0 : index
    %85 = vector.load %arg7[%c18, %c0_61] : memref<27x128xf32, #tpu.memory_space<vmem>>, vector<3x128xf32>
    tpu.vector_store %arg7[%c18, %c0_61], %84 {strides = array<i32>} : memref<27x128xf32, #tpu.memory_space<vmem>>, vector<3x128xf32>,
    %c0_62 = arith.constant 0 : index
    %c2_63 = arith.constant 2 : index
    %c1_64 = arith.constant 1 : index
    %86 = vector.load %arg6[%c0_62, %c2_63, %c1_64] : memref<3x10x18xf32, #tpu.memory_space<vmem>>, vector<3x8x16xf32>
    %87 = vector.shape_cast %86 : vector<3x8x16xf32> to vector<3x128xf32>
    %c21 = arith.constant 21 : index
    %c0_65 = arith.constant 0 : index
    %88 = vector.load %arg7[%c21, %c0_65] : memref<27x128xf32, #tpu.memory_space<vmem>>, vector<3x128xf32>
    tpu.vector_store %arg7[%c21, %c0_65], %87 {strides = array<i32>} : memref<27x128xf32, #tpu.memory_space<vmem>>, vector<3x128xf32>,
    %c0_66 = arith.constant 0 : index
    %c2_67 = arith.constant 2 : index
    %c2_68 = arith.constant 2 : index
    %89 = vector.load %arg6[%c0_66, %c2_67, %c2_68] : memref<3x10x18xf32, #tpu.memory_space<vmem>>, vector<3x8x16xf32>
    %90 = vector.shape_cast %89 : vector<3x8x16xf32> to vector<3x128xf32>
    %c24 = arith.constant 24 : index
    %c0_69 = arith.constant 0 : index
    %91 = vector.load %arg7[%c24, %c0_69] : memref<27x128xf32, #tpu.memory_space<vmem>>, vector<3x128xf32>
    tpu.vector_store %arg7[%c24, %c0_69], %90 {strides = array<i32>} : memref<27x128xf32, #tpu.memory_space<vmem>>, vector<3x128xf32>,
    %c0_70 = arith.constant 0 : index
    %c0_71 = arith.constant 0 : index
    %92 = vector.load %arg3[%c0_70, %c0_71] : memref<16x27xbf16, #tpu.memory_space<vmem>>, vector<16x27xbf16>
    %c0_72 = arith.constant 0 : index
    %c0_73 = arith.constant 0 : index
    %93 = vector.load %arg7[%c0_72, %c0_73] : memref<27x128xf32, #tpu.memory_space<vmem>>, vector<27x128xf32>
    %94 = arith.truncf %93 : vector<27x128xf32> to vector<27x128xbf16>
    %cst_74 = arith.constant dense<0.000000e+00> : vector<16x128xf32>
    %95 = tpu.matmul %92, %94, %cst_74 {dimension_numbers = #tpu.dot_dimension_numbers<[1], [0], [0], [1], [0, 0, 1, 1], [], []>} : vector<16x27xbf16>, vector<27x128xbf16>, vector<16x128xf32> -> vector<16x128xf32>
    %c0_75 = arith.constant 0 : index
    %c0_76 = arith.constant 0 : index
    %96 = vector.load %arg4[%c0_75, %c0_76] : memref<16x1xf32, #tpu.memory_space<vmem>>, vector<16x1xf32>
    %97 = vector.broadcast %96 : vector<16x1xf32> to vector<16x128xf32>
    %98 = arith.addf %95, %97 : vector<16x128xf32>
    %cst_77 = arith.constant 0.000000e+00 : f32
    %99 = vector.broadcast %cst_77 : f32 to vector<16x128xf32>
    %100 = arith.maximumf %98, %99 : vector<16x128xf32>
    %c0_78 = arith.constant 0 : index
    %c0_79 = arith.constant 0 : index
    %c0_80 = arith.constant 0 : index
    %101 = vector.load %arg5[%c0_78, %c0_79, %c0_80] : memref<1x16x128xf32, #tpu.memory_space<vmem>>, vector<1x16x128xf32>
    %102 = vector.shape_cast %101 : vector<1x16x128xf32> to vector<16x128xf32>
    %103 = vector.shape_cast %100 : vector<16x128xf32> to vector<1x16x128xf32>
    tpu.vector_store %arg5[%c0_78, %c0_79, %c0_80], %103 {strides = array<i32>} : memref<1x16x128xf32, #tpu.memory_space<vmem>>, vector<1x16x128xf32>,
    return
  }
  func.func @transform_0(%arg0: i32, %arg1: i32) -> (i32, i32, i32, i32, i32) {
    %c0_i32 = arith.constant 0 : i32
    %c0_i32_0 = arith.constant 0 : i32
    %c0_i32_1 = arith.constant 0 : i32
    %c0_i32_2 = arith.constant 0 : i32
    return %arg0, %c0_i32, %arg1, %c0_i32_0, %c0_i32_1 : i32, i32, i32, i32, i32
  }
  func.func @transform_1(%arg0: i32, %arg1: i32) -> (i32, i32) {
    %c0_i32 = arith.constant 0 : i32
    %c0_i32_0 = arith.constant 0 : i32
    %c0_i32_1 = arith.constant 0 : i32
    return %c0_i32, %c0_i32_0 : i32, i32
  }
  func.func @transform_2(%arg0: i32, %arg1: i32) -> (i32, i32) {
    %c0_i32 = arith.constant 0 : i32
    %c0_i32_0 = arith.constant 0 : i32
    %c0_i32_1 = arith.constant 0 : i32
    return %c0_i32, %c0_i32_0 : i32, i32
  }
  func.func @transform_3(%arg0: i32, %arg1: i32) -> (i32, i32, i32) {
    %c0_i32 = arith.constant 0 : i32
    %c0_i32_0 = arith.constant 0 : i32
    return %arg0, %c0_i32, %arg1 : i32, i32, i32
  }
}

</mosaic_0001>

<bundles_post_ra>
// kernel: upsample_block_normal_forward.1
= control target key start
LH: loop header
LB: loop body
LE: loop exit
PB: predicated region body
PF: predicated region fallthrough
CT: control target
= control target key end

     0   :  { %s2957_s12 = smov 0   ;;  %s2959_s13 = smov 0   ;;  %s3873_s0 = inlined_call_operand.vmem [shape: f32[2,3,2,6,10], index: 0, kind: input, shape index: {}]   ;;  %s3874_s1 = inlined_call_operand.vmem [shape: bf16[16,27], index: 1, kind: input, shape index: {}]   ;;  %s3875_s2 = inlined_call_operand.vmem [shape: f32[16,1], index: 2, kind: input, shape index: {}]   ;;  %s3876_s3 = inlined_call_operand.vmem [shape: f32[2,16,256], index: 3, kind: output, shape index: {}]  }
   0x1   :  { %s2961_s14 = smov 0   ;;  %s2963_s15 = smov 0  }
   0x2   :  { %s2965_s16 = smov 0   ;;  %s2967_s17 = smov 0  }
   0x3   :  { %s2969_s18 = smov 0  }
   0x4 LB: > { %s22_s19 = sadd.s32 1, %s2903_s16  ;;  %s25_s20 = sadd.s32 1, %s2907_s17  ;;  %s2911_s18 = sphi %s2969_s18, %s13_s18   ;;  %s2907_s17 = sphi %s2967_s17, %s3883_s17   ;;  %s2903_s16 = sphi %s2965_s16, %s3882_s16   ;;  %s2899_s15 = sphi %s2963_s15, %s3881_s15   ;;  %s2895_s14 = sphi %s2961_s14, %s3880_s14   ;;  %s2891_s13 = sphi %s2959_s13, %s3879_s13   ;;  %s2887_s12 = sphi %s2957_s12, %s3878_s12  }
   0x5   : > { %p23_p0 = scmp.ge.s32.totalorder %s22_s19, 2  ;;  %s2746_s21 = sadd.s32 4294967295, %s2911_s18  }
   0x6   : > { %p41_p1 = scmp.ne.s32.totalorder %s2891_s13, %s2887_s12  ;;  %p42_p2 = scmp.eq.s32.totalorder %s2911_s18, 0 }
   0x7   : > { %s3885_s19 = smov (%p23_p0, %s22_s19), 0  ;;  %s3887_s20 = smov (!%p23_p0, %s25_s20), %s2907_s17 }
   0x8   : > { %p27_p3 = scmp.ge.s32.totalorder %s3887_s20, 2  ;;  %p115_p4 = scmp.eq.s32.totalorder %s2746_s21, 3 }
   0x9   : > { %s30_s22 = ssub.s32 %s2903_s16, %s3885_s19  ;;  %p43_p5 = por %p42_p2, %p41_p1 }
   0xa   : > { %s3889_s20 = smov (%p27_p3, %s3887_s20), 0  ;;  %p3005_p6 = por %p115_p4, %p41_p1 }
   0xb   : > { %s29_s24 = ssub.s32 %s2907_s17, %s3889_s20  ;;  %s34_s26 = sadd.s32 1, %s2891_s13 }
   0xc   : > { %s31_s25 = sor.u32 %s30_s22, %s29_s24  ;;  %p2749_p8 = scmp.ge.s32.totalorder %s2911_s18, 4 }
   0xd   : > { %p32_p7 = scmp.eq.s32.totalorder %s31_s25, 0 }
   0xe   : > { %143 = sbr.rel (%p2749_p8) target bundleno = 30 (0x1e), region = 24 }
   0xf   : > { %s3013_s27 = scalar_select %p32_p7, %s2891_s13, %s34_s26  }
  0x15   : > { %146 = sbr.rel (!%p43_p5) target bundleno = 30 (0x1e), region = 28  ;;  %s148_s28 = sand.u32 (%p43_p5), 1, %s2891_s13  }
  0x16   : > { %s2772_s29 = smul.u32 (%p43_p5), 6, %s2907_s17 }
  0x17   : > { %s2771_s30 = smul.u32 (%p43_p5), 24, %s148_s28 }
  0x18   : > { %s152_s4 = sadd.s32 (%p43_p5), %s2903_s16, %s2772_s29 }
  0x19   : > { %s2750_s5 = sshll.u32 (%p43_p5), %s152_s4, 3  ;;  %s150_s9 = scalar_lea.vmem (%p43_p5), [#allocation4], %s2771_s30 }
  0x1a   : > { %s154_s8 = scalar_lea.vmem (%p43_p5), %s3873_s0, %s2750_s5 }
  0x1b   : > { %v186_v0 = vld [vmem:[%s154_s8] sm:$0xff] (%p43_p5)  ;;  %v188_v1 = vld [vmem:[%s154_s8 + $0x10] sm:$0xff] (%p43_p5) }
  0x1c   : > { %v190_v2 = vld [vmem:[%s154_s8 + $0x20] sm:$0xff]  ;;  %187 = vst [vmem:[%s150_s9] sm:$0xff] %v186_v0  ;;  %189 = vst [vmem:[%s150_s9 + $0x8] sm:$0xff] %v188_v1 }
  0x1d   : > { %191 = vst [vmem:[%s150_s9 + $0x10] sm:$0xff] %v190_v2 }
  0x1e PF: > { %p2751_p9 = scmp.ge.s32.totalorder %s2911_s18, 1  ;;  %p196_p10 = scmp.lt.s32.totalorder %s2911_s18, 5 }
  0x20   : > { %p197_p11 = pnand %p2751_p9, %p196_p10 }
  0x21   : > { %s203_s10 = sand.u32 (!%p197_p11), 1, %s2887_s12   ;;  %s2913_s22 = smov (!%p197_p11), 127   ;;  %v265_v12 = vlaneseq (!%p197_p11)  ;;  %vm535_vm0 = vcmask (!%p197_p11), 7168   ;;  %v2914_v48 = vmov (!%p197_p11), 0.0   ;;  %vm1397_vm1 = vcmask (!%p197_p11), 146568  }
  0x22   : > { %200 = sbr.rel (%p197_p11) target bundleno = 1224 (0x4c8), region = 66  ;;  %1390 = vst.msk [vmem:[#allocation2] sm:$0xff] (!%p197_p11), %vm535_vm0, %v2914_v48  ;;  %1393 = vst.msk [vmem:[#allocation2 + $0x10] sm:$0xff] (!%p197_p11), %vm535_vm0, %v2914_v48  ;;  %2763 = vmatprep.subr.bf16.mxu0 (!%p197_p11), %v2914_v48  ;;  %s2917_s24 = smov (!%p197_p11), 2   ;;  %vm1040_vm2 = vcmask (!%p197_p11), 15360   ;;  %vm1044_vm3 = vcmask (!%p197_p11), 31744  }
  0x23   : > { %s2773_s11 = smul.u32 (!%p197_p11), 24, %s203_s10  ;;  %v3036_v13 = vshrl.u32 (!%p197_p11), %v265_v12, 7  ;;  %1395 = vst.msk [vmem:[#allocation2 + $0x20] sm:$0xff] (!%p197_p11), %vm535_vm0, %v2914_v48  ;;  %s2918_s25 = smov (!%p197_p11), 4   ;;  %vm1048_vm4 = vcmask (!%p197_p11), 48128   ;;  %vm1052_vm5 = vcmask (!%p197_p11), 64512  }
  0x24   : > { %s2919_s26 = smov (!%p197_p11), 6   ;;  %s2920_s28 = smov (!%p197_p11), 8   ;;  %1398 = vst.msk [vmem:[#allocation2] sm:$0xff] (!%p197_p11), %vm1397_vm1, %v2914_v48  ;;  %1401 = vst.msk [vmem:[#allocation2 + $0x10] sm:$0xff] (!%p197_p11), %vm1397_vm1, %v2914_v48  ;;  %vm1056_vm6 = vcmask (!%p197_p11), 80896   ;;  %vm1060_vm7 = vcmask (!%p197_p11), 97280  }
  0x25   : > { %s205_s21 = scalar_lea.vmem (!%p197_p11), [#allocation4], %s2773_s11  ;;  %v3039_v14 = vsub.s32 (!%p197_p11), 0, %v3036_v13  ;;  %v3042_v15 = vsub.s32 (!%p197_p11), 1, %v3036_v13  ;;  %v3047_v20 = vsub.s32 (!%p197_p11), 3, %v3036_v13  ;;  %v3050_v21 = vsub.s32 (!%p197_p11), 2, %v3036_v13  ;;  %s2921_s29 = smov (!%p197_p11), 10  }
  0x26   : > { %v226_v3 = vld [vmem:[%s205_s21] sm:$0x3f] (!%p197_p11)  ;;  %v228_v4 = vld [vmem:[%s205_s21 + $0x10] sm:$0x3f] (!%p197_p11)  ;;  %v227_v9 = vld [vmem:[%s205_s21 + $0x8] sm:$0x3f] (!%p197_p11) }
  0x27   : > { %v232_v5 = vmul.f32 (!%p197_p11), 0.75, %v226_v3  ;;  %v229_v6 = vmul.f32 (!%p197_p11), 0.25, %v226_v3  ;;  %v234_v7 = vmul.f32 (!%p197_p11), 0.75, %v228_v4  ;;  %v231_v8 = vmul.f32 (!%p197_p11), 0.25, %v228_v4  ;;  %s2922_s30 = smov (!%p197_p11), 12   ;;  %s2923_s4 = smov (!%p197_p11), 14  }
  0x28   : > { %v3031_v10 = vmul.f32 (!%p197_p11), 0.75, %v227_v9  ;;  %v230_v11 = vmul.f32 (!%p197_p11), 0.25, %v227_v9  ;;  %v302_v43 = vsub.s32 (!%p197_p11), 5, %v3036_v13  ;;  %v295_v44 = vsub.s32 (!%p197_p11), 4, %v3036_v13  ;;  %1403 = vst.msk [vmem:[#allocation2 + $0x20] sm:$0xff] (!%p197_p11), %vm1397_vm1, %v2914_v48  ;;  %p1378_p12 = scmp.gt.s32.totalorder (!%p197_p11), %s2895_s14, 0 }
  0x29   : > { %238 = vrot.lane.b32.xlu0 %v232_v5, %s2913_s22  ;;  %253 = vrot.lane.b32.xlu1 %v229_v6, %s2913_s22  ;;  %vm1064_vm8 = vcmask 113664   ;;  %p1384_p13 = scmp.lt.s32.totalorder %s2895_s14, 1  ;;  %vm1391_vm9 = vcmask 1024   ;;  %vm1399_vm10 = vcmask 140424   ;;  %vm1365_vm11 = vcmask 1040384   ;;  %s2925_s7 = smov 1  }
  0x2a   : > { %s1379_s5 = scalar_select %p1378_p12, 1.0, 0.0  ;;  %1392 = vst.msk [vmem:[#allocation2 + $0x8] sm:$0x3] %vm1391_vm9, %v2914_v48  ;;  %1394 = vst.msk [vmem:[#allocation2 + $0x18] sm:$0x3] %vm1391_vm9, %v2914_v48 }
  0x2b   : > { %s1385_s6 = scalar_select %p1384_p13, 1.0, 0.0  ;;  %1396 = vst.msk [vmem:[#allocation2 + $0x28] sm:$0x3] %vm1391_vm9, %v2914_v48  ;;  %vm1493_vm12 = vcmask 131080   ;;  %vm1509_vm13 = vcmask 135180  }
  0x2c   : > { %1400 = vst.msk [vmem:[#allocation2 + $0x8] sm:$0x3] %vm1399_vm10, %v2914_v48  ;;  %1402 = vst.msk [vmem:[#allocation2 + $0x18] sm:$0x3] %vm1399_vm10, %v2914_v48  ;;  %vm1477_vm14 = vcmask 138248   ;;  %s2926_s8 = smov 126  }
  0x2d   : > { %242 = vrot.lane.b32.xlu0 %v234_v7, %s2913_s22  ;;  %257 = vrot.lane.b32.xlu1 %v231_v8, %s2913_s22  ;;  %1404 = vst.msk [vmem:[#allocation2 + $0x28] sm:$0x3] %vm1399_vm10, %v2914_v48  ;;  %s2927_s9 = smov 32   ;;  %s2928_s11 = smov 64   ;;  %vm1611_vm15 = vcmask 130048   ;;  %vm1615_vm1 = vcmask 392192  }
  0x2e   : > { %s2929_s21 = smov 96   ;;  %vm2571_vm9 = vcmask 220160  }
  0x31   : > { %240 = vrot.lane.b32.xlu0 %v3031_v10, %s2913_s22  ;;  %255 = vrot.lane.b32.xlu1 %v230_v11, %s2913_s22 }
  0x9b   : > { %v239_v16 = vpop.permute.xlu0 %238  ;;  %v254_v28 = vpop.permute.xlu1 %253 }
  0x9c   : > { %v247_v17 = vadd.f32 %v239_v16, %v229_v6  ;;  %v262_v29 = vadd.f32 %v254_v28, %v232_v5 }
  0x9e   : > { %v275_v18 = vrot.slane %v247_v17, %v3042_v15  ;;  %v268_v19 = vrot.slane %v247_v17, %v3039_v14  ;;  %v289_v24 = vrot.slane %v247_v17, %v3047_v20  ;;  %v282_v25 = vrot.slane %v247_v17, %v3050_v21 }
  0x9f   : > { %v243_v22 = vpop.permute.xlu0 %242  ;;  %v402_v32 = vrot.slane %v262_v29, %v3042_v15  ;;  %v394_v33 = vrot.slane %v262_v29, %v3039_v14  ;;  %v258_v34 = vpop.permute.xlu1 %257  ;;  %v418_v36 = vrot.slane %v262_v29, %v3047_v20  ;;  %v410_v37 = vrot.slane %v262_v29, %v3050_v21 }
  0xa0   : > { %277 = vbcast.lane.b32.xlu1 %v275_v18, 256  ;;  %270 = vbcast.lane.b32.xlu0 %v268_v19, 256  ;;  %v249_v23 = vadd.f32 %v243_v22, %v231_v8  ;;  %v264_v35 = vadd.f32 %v258_v34, %v234_v7  ;;  %v303_v46 = vrot.slane %v247_v17, %v302_v43 }
  0xa1   : > { %v296_v47 = vrot.slane %v247_v17, %v295_v44  ;;  %v434_v57 = vrot.slane %v262_v29, %v302_v43  ;;  %v426_v58 = vrot.slane %v262_v29, %v295_v44 }
  0xa2   : > { %v359_v26 = vrot.slane %v249_v23, %v3042_v15  ;;  %v352_v27 = vrot.slane %v249_v23, %v3039_v14  ;;  %v373_v30 = vrot.slane %v249_v23, %v3047_v20  ;;  %v366_v31 = vrot.slane %v249_v23, %v3050_v21 }
  0xa3   : > { %v498_v38 = vrot.slane %v264_v35, %v3042_v15  ;;  %v490_v39 = vrot.slane %v264_v35, %v3039_v14  ;;  %v241_v40 = vpop.permute.xlu0 %240  ;;  %v514_v41 = vrot.slane %v264_v35, %v3047_v20  ;;  %v506_v42 = vrot.slane %v264_v35, %v3050_v21  ;;  %v256_v53 = vpop.permute.xlu1 %255 }
  0xa4   : > { %291 = vbcast.lane.b32.xlu1 %v289_v24, 256  ;;  %284 = vbcast.lane.b32.xlu0 %v282_v25, 256  ;;  %v248_v45 = vadd.f32 %v241_v40, %v230_v11  ;;  %v387_v54 = vrot.slane %v249_v23, %v302_v43  ;;  %v380_v55 = vrot.slane %v249_v23, %v295_v44  ;;  %v2915_v25 = vmov 1983009808  }
  0xa5   : > { %v263_v56 = vadd.f32 %v256_v53, %v3031_v10  ;;  %v530_v63 = vrot.slane %v264_v35, %v302_v43  ;;  %v522_v0 = vrot.slane %v264_v35, %v295_v44 }
  0xa6   : > { %v317_v49 = vrot.slane %v248_v45, %v3042_v15  ;;  %v310_v50 = vrot.slane %v248_v45, %v3039_v14  ;;  %v331_v51 = vrot.slane %v248_v45, %v3047_v20  ;;  %v324_v52 = vrot.slane %v248_v45, %v3050_v21 }
  0xa7   : > { %v450_v59 = vrot.slane %v263_v56, %v3042_v15  ;;  %v442_v60 = vrot.slane %v263_v56, %v3039_v14  ;;  %v466_v61 = vrot.slane %v263_v56, %v3047_v20  ;;  %v458_v62 = vrot.slane %v263_v56, %v3050_v21 }
  0xa8   : > { %361 = vbcast.lane.b32.xlu1 %v359_v26, 256  ;;  %354 = vbcast.lane.b32.xlu0 %v352_v27, 256  ;;  %v345_v1 = vrot.slane %v248_v45, %v302_v43  ;;  %v338_v2 = vrot.slane %v248_v45, %v295_v44  ;;  %v482_v3 = vrot.slane %v263_v56, %v302_v43  ;;  %v557_v26 = vunpack.c.l.s4 %v2915_v25 }
  0xa9   : > { %v474_v4 = vrot.slane %v263_v56, %v295_v44 }
  0xaa   : > { %v558_v29 = vunpack.c.0.s8 %v557_v26 }
  0xac   : > { %375 = vbcast.lane.b32.xlu1 %v373_v30, 256  ;;  %368 = vbcast.lane.b32.xlu0 %v366_v31, 256 }
  0xb0   : > { %405 = vbcast.lane.b32.xlu1 %v402_v32, 257  ;;  %397 = vbcast.lane.b32.xlu0 %v394_v33, 257 }
  0xb4   : > { %421 = vbcast.lane.b32.xlu1 %v418_v36, 257  ;;  %413 = vbcast.lane.b32.xlu0 %v410_v37, 257  ;;  %v3097_v36 = vsub.s32 %v558_v29, %v3036_v13  ;;  %v2916_v37 = vmov 1934713408  }
  0xb8   : > { %501 = vbcast.lane.b32.xlu1 %v498_v38, 257  ;;  %493 = vbcast.lane.b32.xlu0 %v490_v39, 257  ;;  %v619_v38 = vunpack.c.l.s4 %v2916_v37 }
  0xba   : > { %v620_v43 = vunpack.c.0.s8 %v619_v38 }
  0xbc   : > { %517 = vbcast.lane.b32.xlu1 %v514_v41, 257  ;;  %509 = vbcast.lane.b32.xlu0 %v506_v42, 257 }
  0xc0   : > { %305 = vbcast.lane.b32.xlu1 %v303_v46, 256  ;;  %298 = vbcast.lane.b32.xlu0 %v296_v47, 256 }
  0xc4   : > { %319 = vbcast.lane.b32.xlu1 %v317_v49, 256  ;;  %312 = vbcast.lane.b32.xlu0 %v310_v50, 256 }
  0xc8   : > { %333 = vbcast.lane.b32.xlu1 %v331_v51, 256  ;;  %326 = vbcast.lane.b32.xlu0 %v324_v52, 256  ;;  %v3108_v51 = vsub.s32 %v620_v43, %v3036_v13 }
  0xcc   : > { %389 = vbcast.lane.b32.xlu1 %v387_v54, 256  ;;  %382 = vbcast.lane.b32.xlu0 %v380_v55, 256 }
  0xd0   : > { %437 = vbcast.lane.b32.xlu1 %v434_v57, 257  ;;  %429 = vbcast.lane.b32.xlu0 %v426_v58, 257 }
  0xd4   : > { %453 = vbcast.lane.b32.xlu1 %v450_v59, 257  ;;  %445 = vbcast.lane.b32.xlu0 %v442_v60, 257 }
  0xd8   : > { %469 = vbcast.lane.b32.xlu1 %v466_v61, 257  ;;  %461 = vbcast.lane.b32.xlu0 %v458_v62, 257 }
  0xdc   : > { %533 = vbcast.lane.b32.xlu1 %v530_v63, 257  ;;  %525 = vbcast.lane.b32.xlu0 %v522_v0, 257 }
  0xe0   : > { %347 = vbcast.lane.b32.xlu1 %v345_v1, 256  ;;  %340 = vbcast.lane.b32.xlu0 %v338_v2, 256 }
  0xe4   : > { %485 = vbcast.lane.b32.xlu1 %v482_v3, 257  ;;  %477 = vbcast.lane.b32.xlu0 %v474_v4, 257 }
 0x112   : > { %v278_v5 = vpop.permute.xlu1 %277  ;;  %v271_v6 = vpop.permute.xlu0 %270 }
 0x116   : > { %v292_v7 = vpop.permute.xlu1 %291  ;;  %v285_v8 = vpop.permute.xlu0 %284 }
 0x11a   : > { %v362_v9 = vpop.permute.xlu1 %361  ;;  %v355_v10 = vpop.permute.xlu0 %354 }
 0x11e   : > { %v376_v11 = vpop.permute.xlu1 %375  ;;  %v369_v12 = vpop.permute.xlu0 %368 }
 0x122   : > { %v406_v15 = vpop.permute.xlu1 %405  ;;  %v398_v16 = vpop.permute.xlu0 %397 }
 0x123   : > { %v3091_v34 = vsel %vm535_vm0, %v278_v5, %v406_v15  ;;  %v3094_v35 = vsel %vm535_vm0, %v271_v6, %v398_v16 }
 0x126   : > { %v422_v17 = vpop.permute.xlu1 %421  ;;  %v414_v18 = vpop.permute.xlu0 %413 }
 0x127   : > { %v3085_v30 = vsel %vm535_vm0, %v292_v7, %v422_v17  ;;  %v3088_v31 = vsel %vm535_vm0, %v285_v8, %v414_v18 }
 0x128   : > { %v570_v39 = vcombine.low %v3091_v34, %v3085_v30  ;;  %v554_v40 = vcombine.low %v3094_v35, %v3088_v31  ;;  %v571_v37 = vcombine.high %v3091_v34, %v3085_v30 }
 0x12a   : > { %v502_v19 = vpop.permute.xlu1 %501  ;;  %v494_v20 = vpop.permute.xlu0 %493  ;;  %v578_v44 = vrot.slane %v570_v39, %v3097_v36  ;;  %v562_v45 = vrot.slane %v554_v40, %v3097_v36 }
 0x12b   : > { %v3119_v61 = vsel %vm535_vm0, %v362_v9, %v502_v19  ;;  %v3122_v63 = vsel %vm535_vm0, %v355_v10, %v494_v20 }
 0x12c   : > { %v616_v52 = vcombine.low %v562_v45, %v578_v44  ;;  %v617_v62 = vcombine.high %v562_v45, %v578_v44  ;;  %v555_v44 = vcombine.high %v3094_v35, %v3088_v31 }
 0x12e   : > { %v518_v21 = vpop.permute.xlu1 %517  ;;  %v510_v22 = vpop.permute.xlu0 %509  ;;  %v3125_v0 = vrot.slane %v616_v52, %v3108_v51  ;;  %v3143_v9 = vrot.slane %v617_v62, %v3108_v51 }
 0x12f   : > { %v3113_v55 = vsel %vm535_vm0, %v376_v11, %v518_v21  ;;  %v3116_v56 = vsel %vm535_vm0, %v369_v12, %v510_v22 }
 0x130   : > { %v838_v2 = vcombine.low %v3119_v61, %v3113_v55  ;;  %v822_v3 = vcombine.low %v3122_v63, %v3116_v56  ;;  %v839_v31 = vcombine.high %v3119_v61, %v3113_v55 }
 0x132   : > { %v306_v23 = vpop.permute.xlu1 %305  ;;  %v299_v24 = vpop.permute.xlu0 %298  ;;  %v846_v10 = vrot.slane %v838_v2, %v3097_v36  ;;  %v830_v11 = vrot.slane %v822_v3, %v3097_v36 }
 0x134   : > { %v884_v25 = vcombine.low %v830_v11, %v846_v10  ;;  %v885_v40 = vcombine.high %v830_v11, %v846_v10  ;;  %v853_v11 = vrot.slane %v839_v31, %v3097_v36 }
 0x136   : > { %v320_v27 = vpop.permute.xlu1 %319  ;;  %v313_v28 = vpop.permute.xlu0 %312 }
 0x13a   : > { %v334_v32 = vpop.permute.xlu1 %333  ;;  %v327_v33 = vpop.permute.xlu0 %326 }
 0x13e   : > { %v390_v41 = vpop.permute.xlu1 %389  ;;  %v383_v42 = vpop.permute.xlu0 %382 }
 0x142   : > { %v438_v46 = vpop.permute.xlu1 %437  ;;  %v430_v47 = vpop.permute.xlu0 %429 }
 0x143   : > { %v541_v49 = vsel %vm535_vm0, %v306_v23, %v438_v46  ;;  %v540_v50 = vsel %vm535_vm0, %v299_v24, %v430_v47 }
 0x144   : > { %v608_v53 = vrot.slane %v541_v49, %v3097_v36  ;;  %v593_v54 = vrot.slane %v540_v50, %v3097_v36  ;;  %v586_v45 = vcombine.high %v540_v50, %v2914_v48 }
 0x146   : > { %v648_v57 = vcombine.low %v593_v54, %v608_v53  ;;  %v649_v58 = vcombine.high %v593_v54, %v608_v53  ;;  %v454_v59 = vpop.permute.xlu1 %453  ;;  %v446_v60 = vpop.permute.xlu0 %445  ;;  %v600_v55 = vrot.slane %v586_v45, %v3097_v36 }
 0x147   : > { %v3156_v19 = vsel %vm535_vm0, %v320_v27, %v454_v59  ;;  %v3159_v20 = vsel %vm535_vm0, %v313_v28, %v446_v60  ;;  %v899_v60 = vrot.slane %v885_v40, %v3108_v51 }
 0x148   : > { %v3128_v1 = vrot.slane %v648_v57, %v3108_v51  ;;  %v3137_v7 = vrot.slane %v649_v58, %v3108_v51  ;;  %v823_v58 = vcombine.high %v3122_v63, %v3116_v56  ;;  %v585_v63 = vrot.slane %v571_v37, %v3097_v36 }
 0x14a   : > { %v470_v4 = vpop.permute.xlu1 %469  ;;  %v462_v5 = vpop.permute.xlu0 %461  ;;  %v681_v6 = vcombine.high %v3125_v0, %v3128_v1  ;;  %v680_v8 = vcombine.low %v3125_v0, %v3128_v1  ;;  %v682_v18 = vcombine.low %v3143_v9, %v3137_v7 }
 0x14b   : > { %v3148_v12 = vsel %vm535_vm0, %v334_v32, %v470_v4  ;;  %v3151_v15 = vsel %vm535_vm0, %v327_v33, %v462_v5  ;;  %v569_v5 = vrot.slane %v555_v44, %v3097_v36 }
 0x14c   : > { %959 = vrot.lane.b32.xlu0 %v681_v6, %s2917_s24  ;;  %v704_v23 = vcombine.low %v3156_v19, %v3148_v12  ;;  %v688_v24 = vcombine.low %v3159_v20, %v3151_v15 }
 0x14e   : > { %v534_v16 = vpop.permute.xlu1 %533  ;;  %v526_v17 = vpop.permute.xlu0 %525  ;;  %v712_v38 = vrot.slane %v704_v23, %v3097_v36  ;;  %v696_v39 = vrot.slane %v688_v24, %v3097_v36 }
 0x14f   : > { %v553_v21 = vsel %vm535_vm0, %v390_v41, %v534_v16  ;;  %v552_v22 = vsel %vm535_vm0, %v383_v42, %v526_v17  ;;  %v601_v41 = vcombine.high %v541_v49, %v2914_v48  ;;  %v3176_v42 = vrot.slane %v884_v25, %v3108_v51 }
 0x150   : > { %971 = vrot.lane.b32.xlu0 %v682_v18, %s2918_s25  ;;  %v876_v26 = vrot.slane %v553_v21, %v3097_v36  ;;  %v861_v27 = vrot.slane %v552_v22, %v3097_v36  ;;  %v869_v30 = vcombine.high %v553_v21, %v2914_v48  ;;  %v854_v34 = vcombine.high %v552_v22, %v2914_v48 }
 0x151   : > { %v750_v35 = vcombine.low %v696_v39, %v712_v38  ;;  %v3198_v59 = vrot.slane %v601_v41, %v3097_v36  ;;  %v837_v16 = vrot.slane %v823_v58, %v3097_v36  ;;  %v751_v17 = vcombine.high %v696_v39, %v712_v38 }
 0x152   : > { %v348_v28 = vpop.permute.xlu1 %347  ;;  %v341_v29 = vpop.permute.xlu0 %340  ;;  %v916_v32 = vcombine.low %v861_v27, %v876_v26  ;;  %v917_v33 = vcombine.high %v861_v27, %v876_v26  ;;  %v3206_v61 = vrot.slane %v869_v30, %v3097_v36  ;;  %v868_v2 = vrot.slane %v854_v34, %v3097_v36 }
 0x153   : > { %v3212_v6 = vrot.slane %v750_v35, %v3108_v51  ;;  %v664_v18 = vcombine.low %v600_v55, %v3198_v59  ;;  %v683_v22 = vcombine.high %v3143_v9, %v3137_v7  ;;  %v689_v7 = vcombine.high %v3159_v20, %v3151_v15 }
 0x154   : > { %v3179_v43 = vrot.slane %v916_v32, %v3108_v51  ;;  %v931_v54 = vrot.slane %v917_v33, %v3108_v51  ;;  %v932_v21 = vcombine.low %v868_v2, %v3206_v61  ;;  %v705_v32 = vcombine.high %v3156_v19, %v3148_v12 }
 0x155   : > { %v765_v9 = vrot.slane %v751_v17, %v3108_v51  ;;  %v672_v37 = vrot.slane %v664_v18, %v3108_v51  ;;  %v703_v15 = vrot.slane %v689_v7, %v3097_v36  ;;  %v901_v31 = vcombine.high %v837_v16, %v853_v11 }
 0x156   : > { %v486_v46 = vpop.permute.xlu1 %485  ;;  %v478_v47 = vpop.permute.xlu0 %477  ;;  %v949_v53 = vcombine.high %v3176_v42, %v3179_v43  ;;  %v948_v62 = vcombine.low %v3176_v42, %v3179_v43  ;;  %v950_v56 = vcombine.low %v899_v60, %v931_v54  ;;  %v951_v33 = vcombine.high %v899_v60, %v931_v54 }
 0x157   : > { %v547_v52 = vsel %vm535_vm0, %v348_v28, %v486_v46  ;;  %v546_v49 = vsel %vm535_vm0, %v341_v29, %v478_v47  ;;  %v632_v28 = vcombine.low %v569_v5, %v585_v63  ;;  %v900_v29 = vcombine.low %v837_v16, %v853_v11 }
 0x158   : > { %v742_v50 = vrot.slane %v547_v52, %v3097_v36  ;;  %v727_v57 = vrot.slane %v546_v49, %v3097_v36  ;;  %963 = vrot.lane.b32.xlu1 %v949_v53, %s2917_s24  ;;  %v735_v24 = vcombine.high %v547_v52, %v2914_v48  ;;  %v720_v25 = vcombine.high %v546_v49, %v2914_v48 }
 0x159   : > { %v940_v41 = vrot.slane %v932_v21, %v3108_v51  ;;  %v640_v12 = vrot.slane %v632_v28, %v3108_v51  ;;  %v719_v19 = vrot.slane %v705_v32, %v3097_v36  ;;  %v908_v20 = vrot.slane %v900_v29, %v3108_v51 }
 0x15a   : > { %v782_v3 = vcombine.low %v727_v57, %v742_v50  ;;  %v783_v4 = vcombine.high %v727_v57, %v742_v50  ;;  %v749_v38 = vrot.slane %v735_v24, %v3097_v36  ;;  %v734_v39 = vrot.slane %v720_v25, %v3097_v36 }
 0x15b   : > { %v684_v44 = vcombine.low %v640_v12, %v672_v37  ;;  %v952_v30 = vcombine.low %v908_v20, %v940_v41  ;;  %v766_v34 = vcombine.low %v703_v15, %v719_v19  ;;  %v665_v46 = vcombine.high %v600_v55, %v3198_v59 }
 0x15c   : > { %v3215_v10 = vrot.slane %v782_v3, %v3108_v51  ;;  %975 = vrot.lane.b32.xlu1 %v950_v56, %s2918_s25  ;;  %v797_v26 = vrot.slane %v783_v4, %v3108_v51  ;;  %v798_v45 = vcombine.low %v734_v39, %v749_v38  ;;  %v933_v52 = vcombine.high %v868_v2, %v3206_v61 }
 0x15d   : > { %v685_v49 = vcombine.high %v640_v12, %v672_v37  ;;  %v633_v54 = vcombine.high %v569_v5, %v585_v63  ;;  %v774_v35 = vrot.slane %v766_v34, %v3108_v51  ;;  %v953_v50 = vcombine.high %v908_v20, %v940_v41 }
 0x15e   : > { %v815_v23 = vcombine.high %v3212_v6, %v3215_v10  ;;  %v814_v27 = vcombine.low %v3212_v6, %v3215_v10  ;;  %v816_v40 = vcombine.low %v765_v9, %v797_v26  ;;  %v817_v47 = vcombine.high %v765_v9, %v797_v26 }
 0x15f   : > { %v806_v53 = vrot.slane %v798_v45, %v3108_v51  ;;  %v679_v57 = vrot.slane %v665_v46, %v3108_v51  ;;  %v947_v60 = vrot.slane %v933_v52, %v3108_v51  ;;  %v647_v59 = vrot.slane %v633_v54, %v3108_v51 }
 0x160   : > { %961 = vrot.lane.b32.xlu0 %v815_v23, %s2917_s24  ;;  %983 = vrot.lane.b32.xlu1 %v683_v22, %s2919_s26  ;;  %v915_v55 = vrot.slane %v901_v31, %v3108_v51  ;;  %v799_v2 = vcombine.high %v734_v39, %v749_v38  ;;  %v767_v4 = vcombine.high %v703_v15, %v719_v19  ;;  %v2924_v39 = vmov 1966171168   ;;  %s2931_s24 = smov 48  }
 0x161   : > { %v818_v58 = vcombine.low %v774_v35, %v806_v53  ;;  %v686_v61 = vcombine.low %v647_v59, %v679_v57  ;;  %v819_v56 = vcombine.high %v774_v35, %v806_v53  ;;  %v687_v63 = vcombine.high %v647_v59, %v679_v57 }
 0x162   : > { %v954_v3 = vcombine.low %v915_v55, %v947_v60  ;;  %v813_v5 = vrot.slane %v799_v2, %v3108_v51  ;;  %v781_v11 = vrot.slane %v767_v4, %v3108_v51  ;;  %v955_v16 = vcombine.high %v915_v55, %v947_v60 }
 0x163   : > { %v3290_v57 = vstv %s1379_s5  ;;  %vm1613_vm0 = vcmask 261120  }
 0x164   : > { %987 = vrot.lane.b32.xlu0 %v951_v33, %s2919_s26  ;;  %973 = vrot.lane.b32.xlu1 %v816_v40, %s2918_s25  ;;  %v820_v17 = vcombine.low %v781_v11, %v813_v5  ;;  %v821_v18 = vcombine.high %v781_v11, %v813_v5  ;;  %v1102_v40 = vunpack.c.l.s4 %v2924_v39  ;;  %v1386_v11 = vstv %s1385_s6  ;;  %s2932_s25 = smov 80  }
 0x166   : > { %v1103_v0 = vunpack.c.0.s8 %v1102_v40 }
 0x168   : > { %995 = vrot.lane.b32.xlu0 %v684_v44, %s2920_s28  ;;  %999 = vrot.lane.b32.xlu1 %v952_v30, %s2920_s28  ;;  %v3286_v54 = vsub.s32 %v1103_v0, %v3036_v13 }
 0x16c   : > { %985 = vrot.lane.b32.xlu0 %v817_v47, %s2919_s26  ;;  %1007 = vrot.lane.b32.xlu1 %v685_v49, %s2921_s29  ;;  %s2933_s26 = smov 112  }
 0x170   : > { %1011 = vrot.lane.b32.xlu0 %v953_v50, %s2921_s29  ;;  %997 = vrot.lane.b32.xlu1 %v818_v58, %s2920_s28 }
 0x174   : > { %1019 = vrot.lane.b32.xlu0 %v686_v61, %s2922_s30  ;;  %1023 = vrot.lane.b32.xlu1 %v954_v3, %s2922_s30 }
 0x178   : > { %1009 = vrot.lane.b32.xlu0 %v819_v56, %s2921_s29  ;;  %1031 = vrot.lane.b32.xlu1 %v687_v63, %s2923_s4 }
 0x17c   : > { %1035 = vrot.lane.b32.xlu0 %v955_v16, %s2923_s4  ;;  %1021 = vrot.lane.b32.xlu1 %v820_v17, %s2922_s30 }
 0x180   : > { %1033 = vrot.lane.b32.xlu0 %v821_v18, %s2923_s4 }
 0x1be   : > { %v960_v21 = vpop.permute.xlu0 %959 }
 0x1bf   : > { %v1041_v41 = vsel %vm1040_vm2, %v680_v8, %v960_v21 }
 0x1c2   : > { %v972_v23 = vpop.permute.xlu0 %971 }
 0x1c3   : > { %v1045_v19 = vsel %vm1044_vm3, %v1041_v41, %v972_v23 }
 0x1ca   : > { %v964_v22 = vpop.permute.xlu1 %963 }
 0x1cb   : > { %v1043_v44 = vsel %vm1040_vm2, %v948_v62, %v964_v22 }
 0x1ce   : > { %v976_v24 = vpop.permute.xlu1 %975 }
 0x1cf   : > { %v1047_v1 = vsel %vm1044_vm3, %v1043_v44, %v976_v24 }
 0x1d2   : > { %v962_v25 = vpop.permute.xlu0 %961  ;;  %v984_v26 = vpop.permute.xlu1 %983 }
 0x1d3   : > { %v1049_v20 = vsel %vm1048_vm4, %v1045_v19, %v984_v26  ;;  %v1042_v47 = vsel %vm1040_vm2, %v814_v27, %v962_v25  ;;  %vm1617_vm2 = vcmask 523264  }
 0x1d6   : > { %v988_v28 = vpop.permute.xlu0 %987  ;;  %v974_v29 = vpop.permute.xlu1 %973 }
 0x1d7   : > { %v1051_v34 = vsel %vm1048_vm4, %v1047_v1, %v988_v28  ;;  %v1046_v31 = vsel %vm1044_vm3, %v1042_v47, %v974_v29  ;;  %vm1619_vm3 = vcmask 654336  }
 0x1da   : > { %v996_v32 = vpop.permute.xlu0 %995  ;;  %v1000_v7 = vpop.permute.xlu1 %999 }
 0x1db   : > { %v1053_v45 = vsel %vm1052_vm5, %v1049_v20, %v996_v32  ;;  %v1055_v43 = vsel %vm1052_vm5, %v1051_v34, %v1000_v7 }
 0x1de   : > { %v986_v9 = vpop.permute.xlu0 %985  ;;  %v1008_v33 = vpop.permute.xlu1 %1007 }
 0x1df   : > { %v1057_v8 = vsel %vm1056_vm6, %v1053_v45, %v1008_v33  ;;  %v1050_v6 = vsel %vm1048_vm4, %v1046_v31, %v986_v9  ;;  %vm1621_vm4 = vcmask 785408  }
 0x1e2   : > { %v1012_v37 = vpop.permute.xlu0 %1011  ;;  %v998_v38 = vpop.permute.xlu1 %997 }
 0x1e3   : > { %v1059_v52 = vsel %vm1056_vm6, %v1055_v43, %v1012_v37  ;;  %v1054_v59 = vsel %vm1052_vm5, %v1050_v6, %v998_v38  ;;  %vm1623_vm5 = vcmask 916480  }
 0x1e6   : > { %v1020_v12 = vpop.permute.xlu0 %1019  ;;  %v1024_v15 = vpop.permute.xlu1 %1023 }
 0x1e7   : > { %v1061_v46 = vsel %vm1060_vm7, %v1057_v8, %v1020_v12  ;;  %v1063_v35 = vsel %vm1060_vm7, %v1059_v52, %v1024_v15 }
 0x1ea   : > { %v1010_v30 = vpop.permute.xlu0 %1009  ;;  %v1032_v42 = vpop.permute.xlu1 %1031 }
 0x1eb   : > { %v1065_v62 = vsel %vm1064_vm8, %v1061_v46, %v1032_v42  ;;  %v1058_v3 = vsel %vm1056_vm6, %v1054_v59, %v1010_v30  ;;  %vm2934_vm6 = vmmov 0  }
 0x1ec   : > { %v1068_v49 = vmul.f32 0.25, %v1065_v62  ;;  %v1071_v53 = vmul.f32 0.75, %v1065_v62  ;;  %2767 = vmatprep.mubr.msk.bf16.mxu0 %vm2934_vm6, %v2914_v48 }
 0x1ee   : > { %v1036_v50 = vpop.permute.xlu0 %1035  ;;  %v1077_v10 = vrot.slane %v1071_v53, 1  ;;  %v1089_v27 = vrot.slane %v1068_v49, 1  ;;  %v1022_v58 = vpop.permute.xlu1 %1021 }
 0x1ef   : > { %v1067_v60 = vsel %vm1064_vm8, %v1063_v35, %v1036_v50  ;;  %v1062_v4 = vsel %vm1060_vm7, %v1058_v3, %v1022_v58  ;;  %vm2575_vm7 = vcmask 1044480  }
 0x1f0   : > { %v1070_v13 = vmul.f32 0.25, %v1067_v60  ;;  %v1073_v55 = vmul.f32 0.75, %v1067_v60  ;;  %v1083_v61 = vadd.f32 %v1077_v10, %v1068_v49  ;;  %v1095_v2 = vadd.f32 %v1089_v27, %v1071_v53 }
 0x1f2   : > { %v1079_v56 = vrot.slane %v1073_v55, 1  ;;  %v1091_v63 = vrot.slane %v1070_v13, 1  ;;  %v1034_v5 = vpop.permute.xlu0 %1033  ;;  %v1107_v16 = vrot.slane %v1083_v61, %v3286_v54  ;;  %v1188_v17 = vcombine.high %v1095_v2, %v1095_v2 }
 0x1f3   : > { %v1195_v18 = vrot.slane %v1095_v2, %v3286_v54  ;;  %v1066_v21 = vsel %vm1064_vm8, %v1062_v4, %v1034_v5  ;;  %v1381_v47 = vmul.f32 %v3290_v57, %v1095_v2  ;;  %v1387_v53 = vmul.f32 %v1386_v11, %v1083_v61 }
 0x1f4   : > { %v1085_v22 = vadd.f32 %v1079_v56, %v1070_v13  ;;  %v1097_v23 = vadd.f32 %v1091_v63, %v1073_v55  ;;  %v1069_v24 = vmul.f32 0.25, %v1066_v21  ;;  %v1072_v25 = vmul.f32 0.75, %v1066_v21 }
 0x1f5   : > { %v1108_v26 = vcombine.high %v1107_v16, %v1107_v16  ;;  %v1115_v28 = vrot.slane %v1107_v16, %v3286_v54  ;;  %v1202_v29 = vrot.slane %v1188_v17, %v3286_v54  ;;  %v1203_v32 = vcombine.high %v1195_v18, %v1195_v18  ;;  %1484 = vrot.lane.b32.xlu1 %v1381_v47, %s2925_s7 }
 0x1f6   : > { %v1210_v7 = vrot.slane %v1195_v18, %v3286_v54  ;;  %v1155_v9 = vrot.slane %v1085_v22, %v3286_v54  ;;  %v1266_v33 = vcombine.high %v1097_v23, %v1097_v23  ;;  %v1273_v37 = vrot.slane %v1097_v23, %v3286_v54 }
 0x1f7   : > { %v1122_v38 = vrot.slane %v1108_v26, %v3286_v54  ;;  %v1123_v39 = vcombine.high %v1115_v28, %v1115_v28  ;;  %v1217_v40 = vrot.slane %v1202_v29, %v3286_v54  ;;  %v1224_v41 = vrot.slane %v1203_v32, %v3286_v54 }
 0x1f8   : > { %v1225_v12 = vcombine.high %v1210_v7, %v1210_v7  ;;  %v1156_v19 = vcombine.high %v1155_v9, %v1155_v9  ;;  %v3317_v15 = vrot.slane %v1155_v9, %v3286_v54  ;;  %v1280_v20 = vrot.slane %v1266_v33, %v3286_v54 }
 0x1f9   : > { %v1124_v44 = vcombine.high %v1122_v38, %v1122_v38  ;;  %v1226_v45 = vcombine.high %v1224_v41, %v1224_v41  ;;  %v1281_v0 = vcombine.high %v1273_v37, %v1273_v37  ;;  %v1288_v1 = vrot.slane %v1273_v37, %v3286_v54  ;;  %1500 = vrot.lane.b32.xlu1 %v1387_v53, %s2925_s7 }
 0x1fa   : > { %v3322_v8 = vrot.slane %v1156_v19, %v3286_v54  ;;  %v1171_v30 = vcombine.high %v3317_v15, %v3317_v15  ;;  %v1295_v34 = vrot.slane %v1280_v20, %v3286_v54  ;;  %v1078_v46 = vrot.slane %v1072_v25, 1 }
 0x1fb   : > { %v1302_v42 = vrot.slane %v1281_v0, %v3286_v54  ;;  %v1303_v43 = vcombine.high %v1288_v1, %v1288_v1  ;;  %v1090_v62 = vrot.slane %v1069_v24, 1  ;;  %v1383_v31 = vmul.f32 %v3290_v57, %v1097_v23 }
 0x1fc   : > { %v1172_v52 = vcombine.high %v3322_v8, %v3322_v8  ;;  %v1084_v49 = vadd.f32 %v1078_v46, %v1069_v24  ;;  %v1389_v6 = vmul.f32 %v1386_v11, %v1085_v22  ;;  %v1308_v10 = vrot.slane %v1224_v41, %v3039_v14 }
 0x1fd   : > { %v1304_v35 = vcombine.high %v1302_v42, %v1302_v42  ;;  %v1096_v50 = vadd.f32 %v1090_v62, %v1072_v25  ;;  %1488 = vrot.lane.b32.xlu0 %v1383_v31, %s2925_s7  ;;  %v1312_v60 = vrot.slane %v1225_v12, %v3039_v14  ;;  %v1316_v59 = vrot.slane %v1226_v45, %v3039_v14 }
 0x1fe   : > { %v1131_v27 = vrot.slane %v1084_v49, %v3286_v54  ;;  %v1388_v58 = vmul.f32 %v1386_v11, %v1084_v49  ;;  %v1320_v2 = vrot.slane %v1217_v40, %v3039_v14  ;;  %v1366_v56 = vsel %vm1365_vm11, %v1115_v28, %v1308_v10 }
 0x1ff   : > { %v1227_v13 = vcombine.high %v1096_v50, %v1096_v50  ;;  %v1234_v55 = vrot.slane %v1096_v50, %v3286_v54  ;;  %v1382_v61 = vmul.f32 %v3290_v57, %v1096_v50  ;;  %v1367_v63 = vsel %vm1365_vm11, %v1122_v38, %v1312_v60 }
 0x200   : > { %v1132_v3 = vcombine.high %v1131_v27, %v1131_v27  ;;  %v1139_v4 = vrot.slane %v1131_v27, %v3286_v54  ;;  %v1368_v17 = vsel %vm1365_vm11, %v1123_v39, %v1316_v59  ;;  %v1369_v21 = vsel %vm1365_vm11, %v1124_v44, %v1320_v2  ;;  %1502 = vrot.lane.b32.xlu1 %v1388_v58, %s2925_s7 }
 0x201   : > { %v1241_v5 = vrot.slane %v1227_v13, %v3286_v54  ;;  %v1242_v11 = vcombine.high %v1234_v55, %v1234_v55  ;;  %v1249_v16 = vrot.slane %v1234_v55, %v3286_v54  ;;  %1486 = vrot.lane.b32.xlu0 %v1382_v61, %s2925_s7  ;;  %v1417_v22 = vcombine.low %v1366_v56, %v1367_v63 }
 0x202   : > { %v1146_v57 = vrot.slane %v1132_v3, %v3286_v54  ;;  %v1147_v18 = vcombine.high %v1139_v4, %v1139_v4  ;;  %v1418_v26 = vcombine.low %v1368_v17, %v1369_v21  ;;  %v1340_v32 = vrot.slane %v1302_v42, %v3039_v14 }
 0x203   : > { %v1256_v23 = vrot.slane %v1241_v5, %v3286_v54  ;;  %v1263_v24 = vrot.slane %v1242_v11, %v3286_v54  ;;  %v1264_v25 = vcombine.high %v1249_v16, %v1249_v16  ;;  %v1425_v29 = vrot.slane %v1417_v22, %v3097_v36 }
 0x204   : > { %v1148_v28 = vcombine.high %v1146_v57, %v1146_v57  ;;  %v1344_v7 = vrot.slane %v1303_v43, %v3039_v14  ;;  %v1432_v33 = vrot.slane %v1418_v26, %v3097_v36  ;;  %v1348_v37 = vrot.slane %v1304_v35, %v3039_v14 }
 0x205   : > { %v1265_v9 = vcombine.high %v1263_v24, %v1263_v24  ;;  %v1352_v38 = vrot.slane %v1295_v34, %v3039_v14  ;;  %1504 = vrot.lane.b32.xlu0 %v1389_v6, %s2925_s7  ;;  %v1374_v54 = vsel %vm1365_vm11, %v3317_v15, %v1340_v32  ;;  %v1324_v40 = vrot.slane %v1263_v24, %v3039_v14 }
 0x206   : > { %v1375_v39 = vsel %vm1365_vm11, %v3322_v8, %v1344_v7  ;;  %v1328_v41 = vrot.slane %v1264_v25, %v3039_v14  ;;  %v1433_v12 = vcombine.low %v1425_v29, %v1432_v33  ;;  %v1376_v19 = vsel %vm1365_vm11, %v1171_v30, %v1348_v37 }
 0x207   : > { %v1377_v20 = vsel %vm1365_vm11, %v1172_v52, %v1352_v38  ;;  %v1451_v44 = vcombine.low %v1374_v54, %v1375_v39  ;;  %v1332_v0 = vrot.slane %v1265_v9, %v3039_v14  ;;  %v1336_v1 = vrot.slane %v1256_v23, %v3039_v14 }
 0x208   : > { %v1452_v45 = vcombine.low %v1376_v19, %v1377_v20  ;;  %v1370_v15 = vsel %vm1365_vm11, %v1139_v4, %v1324_v40  ;;  %1468 = vrot.lane.b32.xlu1 %v1433_v12, %s2925_s7  ;;  %v1371_v34 = vsel %vm1365_vm11, %v1146_v57, %v1328_v41  ;;  %vm2576_vm8 = vcmask 1045504  }
 0x209   : > { %v1459_v8 = vrot.slane %v1451_v44, %v3097_v36  ;;  %v1372_v30 = vsel %vm1365_vm11, %v1147_v18, %v1332_v0  ;;  %v1373_v42 = vsel %vm1365_vm11, %v1148_v28, %v1336_v1  ;;  %v1434_v43 = vcombine.low %v1370_v15, %v1371_v34 }
 0x20a   : > { %v1466_v46 = vrot.slane %v1452_v45, %v3097_v36  ;;  %v1435_v62 = vcombine.low %v1372_v30, %v1373_v42 }
 0x20b   : > { %v1442_v52 = vrot.slane %v1434_v43, %v3097_v36 }
 0x20c   : > { %v1467_v47 = vcombine.low %v1459_v8, %v1466_v46  ;;  %v1449_v14 = vrot.slane %v1435_v62, %v3097_v36 }
 0x20e   : > { %1472 = vrot.lane.b32.xlu0 %v1467_v47, %s2925_s7  ;;  %v1450_v49 = vcombine.low %v1442_v52, %v1449_v14 }
 0x210   : > { %1470 = vrot.lane.b32.xlu1 %v1450_v49, %s2925_s7  ;;  %s2752_s7 = sshll.u32 %s203_s10, 4 }
 0x267   : > { %v1485_v53 = vpop.permute.xlu1 %1484 }
 0x268   : > { %1494 = vst.msk [vmem:[#allocation2] sm:$0x1] %vm1493_vm12, %v1485_v53 }
 0x26b   : > { %v1501_v35 = vpop.permute.xlu1 %1500 }
 0x26c   : > { %1510 = vst.msk [vmem:[#allocation2 + $0x5] sm:$0x10] %vm1509_vm13, %v1501_v35 }
 0x26f   : > { %v1489_v31 = vpop.permute.xlu0 %1488 }
 0x270   : > { %1496 = vst.msk [vmem:[#allocation2 + $0x20] sm:$0x1] %vm1493_vm12, %v1489_v31 }
 0x272   : > { %v1503_v6 = vpop.permute.xlu1 %1502 }
 0x273   : > { %v1487_v50 = vpop.permute.xlu0 %1486  ;;  %1511 = vst.msk [vmem:[#allocation2 + $0x15] sm:$0x10] %vm1509_vm13, %v1503_v6 }
 0x274   : > { %1495 = vst.msk [vmem:[#allocation2 + $0x10] sm:$0x1] %vm1493_vm12, %v1487_v50 }
 0x277   : > { %v1505_v10 = vpop.permute.xlu0 %1504 }
 0x278   : > { %1512 = vst.msk [vmem:[#allocation2 + $0x25] sm:$0x10] %vm1509_vm13, %v1505_v10 }
 0x27a   : > { %v1469_v27 = vpop.permute.xlu1 %1468 }
 0x27b   : > { %1478 = vst.msk [vmem:[#allocation2 + $0x1] sm:$0xff] %vm1477_vm14, %v1469_v27 }
 0x280   : > { %v1473_v58 = vpop.permute.xlu0 %1472 }
 0x281   : > { %1480 = vst.msk [vmem:[#allocation2 + $0x21] sm:$0xff] %vm1477_vm14, %v1473_v58 }
 0x282   : > { %v1471_v60 = vpop.permute.xlu1 %1470  ;;  %v1626_v59 = vld [vmem:[#allocation2] sm:$0xff] }
 0x283   : > { %1479 = vst.msk [vmem:[#allocation2 + $0x11] sm:$0xff] %vm1477_vm14, %v1471_v60  ;;  %1632 = vrot.lane.b32.xlu0 %v1626_v59, %s2913_s22  ;;  %v1968_v55 = vld [vmem:[#allocation2 + $0x1] sm:$0xff] }
 0x284   : > { %v2310_v4 = vld [vmem:[#allocation2 + $0x2] sm:$0xff] }
 0x287   : > { %1750 = vrot.lane.b32.xlu0 %v1626_v59, %s2926_s8 }
 0x288   : > { %v1628_v13 = vld [vmem:[#allocation2 + $0x20] sm:$0xff] }
 0x289   : > { %1636 = vrot.lane.b32.xlu1 %v1628_v13, %s2913_s22  ;;  %v1970_v61 = vld [vmem:[#allocation2 + $0x21] sm:$0xff]  ;;  %v1516_v56 = vcombine.low %v1626_v59, %v1628_v13  ;;  %v1517_v28 = vcombine.high %v1626_v59, %v1628_v13 }
 0x28a   : > { %v1627_v2 = vld [vmem:[#allocation2 + $0x10] sm:$0xff]  ;;  %v2312_v11 = vld [vmem:[#allocation2 + $0x22] sm:$0xff]  ;;  %v1866_v17 = vcombine.high %v1968_v55, %v1970_v61  ;;  %v1865_v57 = vcombine.low %v1968_v55, %v1970_v61 }
 0x28b   : > { %1974 = vrot.lane.b32.xlu0 %v1968_v55, %s2913_s22  ;;  %v1969_v3 = vld [vmem:[#allocation2 + $0x11] sm:$0xff]  ;;  %v1539_v63 = vrot.slane %v1627_v2, %v3097_v36  ;;  %v1524_v16 = vrot.slane %v1516_v56, %v3097_v36  ;;  %v1532_v24 = vcombine.high %v1627_v2, %v2914_v48  ;;  %v1531_v33 = vrot.slane %v1517_v28, %v3097_v36 }
 0x28c   : > { %v1881_v5 = vcombine.high %v1969_v3, %v2914_v48  ;;  %v2311_v22 = vld [vmem:[#allocation2 + $0x12] sm:$0xff]  ;;  %v1888_v23 = vrot.slane %v1969_v3, %v3097_v36  ;;  %v1880_v25 = vrot.slane %v1866_v17, %v3097_v36  ;;  %v1873_v26 = vrot.slane %v1865_v57, %v3097_v36 }
 0x28d   : > { %1754 = vrot.lane.b32.xlu1 %v1628_v13, %s2926_s8  ;;  %v1548_v18 = vcombine.high %v1524_v16, %v1539_v63  ;;  %v1546_v9 = vrot.slane %v1532_v24, %v3097_v36  ;;  %v2207_v37 = vcombine.low %v2310_v4, %v2312_v11  ;;  %v1547_v39 = vcombine.low %v1524_v16, %v1539_v63 }
 0x28e   : > { %v1895_v21 = vrot.slane %v1881_v5, %v3097_v36  ;;  %v1897_v7 = vcombine.high %v1873_v26, %v1888_v23  ;;  %v2230_v12 = vrot.slane %v2311_v22, %v3097_v36  ;;  %v2223_v0 = vcombine.high %v2311_v22, %v2914_v48 }
 0x28f   : > { %2092 = vrot.lane.b32.xlu0 %v1968_v55, %s2926_s8  ;;  %v1562_v29 = vrot.slane %v1548_v18, %v3108_v51  ;;  %v1563_v41 = vcombine.low %v1531_v33, %v1546_v9  ;;  %v2215_v19 = vrot.slane %v2207_v37, %v3097_v36  ;;  %v3420_v44 = vrot.slane %v1547_v39, %v3108_v51 }
 0x290   : > { %v1912_v32 = vcombine.low %v1880_v25, %v1895_v21  ;;  %v1913_v54 = vcombine.high %v1880_v25, %v1895_v21  ;;  %v1911_v40 = vrot.slane %v1897_v7, %v3108_v51  ;;  %v2208_v15 = vcombine.high %v2310_v4, %v2312_v11 }
 0x291   : > { %1978 = vrot.lane.b32.xlu1 %v1970_v61, %s2913_s22  ;;  %v1571_v45 = vrot.slane %v1563_v41, %v3108_v51  ;;  %v2239_v1 = vcombine.high %v2215_v19, %v2230_v12  ;;  %v2238_v8 = vcombine.low %v2215_v19, %v2230_v12  ;;  %v1579_v34 = vcombine.high %v3420_v44, %v2914_v48 }
 0x292   : > { %v1920_v38 = vrot.slane %v1912_v32, %v3108_v51  ;;  %v1927_v20 = vrot.slane %v1913_v54, %v3108_v51  ;;  %v1564_v30 = vcombine.high %v1531_v33, %v1546_v9  ;;  %v2237_v42 = vrot.slane %v2223_v0, %v3097_v36 }
 0x293   : > { %1634 = vrot.lane.b32.xlu0 %v1627_v2, %s2913_s22  ;;  %v2253_v46 = vrot.slane %v2239_v1, %v3108_v51  ;;  %v2222_v43 = vrot.slane %v2208_v15, %v3097_v36  ;;  %v1580_v62 = vcombine.high %v1562_v29, %v2914_v48  ;;  %v3435_v47 = vrot.slane %v2238_v8, %v3108_v51 }
 0x294   : > { %v1578_v52 = vrot.slane %v1564_v30, %v3108_v51  ;;  %v1896_v53 = vcombine.low %v1873_v26, %v1888_v23  ;;  %v1581_v50 = vcombine.high %v1571_v45, %v2914_v48  ;;  %v1929_v59 = vcombine.high %v1911_v40, %v2914_v48 }
 0x295   : > { %2096 = vrot.lane.b32.xlu1 %v1970_v61, %s2926_s8  ;;  %v2254_v14 = vcombine.low %v2222_v43, %v2237_v42  ;;  %v2270_v49 = vcombine.high %v3435_v47, %v2914_v48  ;;  %v2255_v35 = vcombine.high %v2222_v43, %v2237_v42  ;;  %v2271_v27 = vcombine.high %v2253_v46, %v2914_v48 }
 0x296   : > { %v3448_v10 = vrot.slane %v1896_v53, %v3108_v51  ;;  %v1582_v60 = vcombine.high %v1578_v52, %v2914_v48  ;;  %v1930_v55 = vcombine.high %v1920_v38, %v2914_v48 }
 0x297   : > { %1976 = vrot.lane.b32.xlu0 %v1969_v3, %s2913_s22  ;;  %v2262_v31 = vrot.slane %v2254_v14, %v3108_v51  ;;  %v2269_v6 = vrot.slane %v2255_v35, %v3108_v51 }
 0x298   : > { %v1928_v58 = vcombine.high %v3448_v10, %v2914_v48 }
 0x299   : > { %1752 = vrot.lane.b32.xlu1 %v1627_v2, %s2926_s8  ;;  %v2272_v13 = vcombine.high %v2262_v31, %v2914_v48  ;;  %v2273_v61 = vcombine.high %v2269_v6, %v2914_v48  ;;  %v1931_v2 = vcombine.high %v1927_v20, %v2914_v48 }
 0x29b   : > { %2316 = vrot.lane.b32.xlu0 %v2310_v4, %s2913_s22 }
 0x29d   : > { %2094 = vrot.lane.b32.xlu1 %v1969_v3, %s2926_s8 }
 0x29f   : > { %2434 = vrot.lane.b32.xlu0 %v2310_v4, %s2926_s8 }
 0x2a1   : > { %2320 = vrot.lane.b32.xlu1 %v2312_v11, %s2913_s22 }
 0x2a3   : > { %2318 = vrot.lane.b32.xlu0 %v2311_v22, %s2913_s22  ;;  %s2930_s22 = smov 16  }
 0x2a5   : > { %2438 = vrot.lane.b32.xlu1 %v2312_v11, %s2926_s8 }
 0x2a7   : > { %1588 = vrot.lane.b32.xlu0 %v1562_v29, %s2927_s9 }
 0x2a9   : > { %2436 = vrot.lane.b32.xlu1 %v2311_v22, %s2926_s8  ;;  %s224_s8 = scalar_lea.vmem [#allocation5], %s2752_s7 }
 0x2ab   : > { %1945 = vrot.lane.b32.xlu0 %v1920_v38, %s2928_s11 }
 0x2ad   : > { %1937 = vrot.lane.b32.xlu1 %v1911_v40, %s2927_s9 }
 0x2af   : > { %1953 = vrot.lane.b32.xlu0 %v1927_v20, %s2929_s21 }
 0x2b1   : > { %1596 = vrot.lane.b32.xlu1 %v1571_v45, %s2928_s11 }
 0x2b3   : > { %1584 = vrot.lane.b32.xlu0 %v1579_v34, %s2930_s22 }
 0x2b5   : > { %2279 = vrot.lane.b32.xlu1 %v2253_v46, %s2927_s9 }
 0x2b7   : > { %1592 = vrot.lane.b32.xlu0 %v1580_v62, %s2931_s24 }
 0x2b9   : > { %1604 = vrot.lane.b32.xlu1 %v1578_v52, %s2929_s21 }
 0x2bb   : > { %2275 = vrot.lane.b32.xlu0 %v2270_v49, %s2930_s22 }
 0x2bd   : > { %2287 = vrot.lane.b32.xlu1 %v2262_v31, %s2928_s11 }
 0x2bf   : > { %1600 = vrot.lane.b32.xlu0 %v1581_v50, %s2932_s25 }
 0x2c1   : > { %2295 = vrot.lane.b32.xlu1 %v2269_v6, %s2929_s21 }
 0x2c3   : > { %2283 = vrot.lane.b32.xlu0 %v2271_v27, %s2931_s24 }
 0x2c5   : > { %1933 = vrot.lane.b32.xlu1 %v1928_v58, %s2930_s22 }
 0x2c7   : > { %1608 = vrot.lane.b32.xlu0 %v1582_v60, %s2933_s26 }
 0x2c9   : > { %1941 = vrot.lane.b32.xlu1 %v1929_v59, %s2931_s24 }
 0x2cb   : > { %2291 = vrot.lane.b32.xlu0 %v2272_v13, %s2932_s25 }
 0x2cd   : > { %1949 = vrot.lane.b32.xlu1 %v1930_v55, %s2932_s25 }
 0x2cf   : > { %2299 = vrot.lane.b32.xlu0 %v2273_v61, %s2933_s26 }
 0x2d1   : > { %1957 = vrot.lane.b32.xlu1 %v1931_v2, %s2933_s26 }
 0x2f5   : > { %v1633_v3 = vpop.permute.xlu0 %1632 }
 0x2f9   : > { %v1751_v4 = vpop.permute.xlu0 %1750 }
 0x2fb   : > { %v1637_v56 = vpop.permute.xlu1 %1636 }
 0x2fc   : > { %v1641_v16 = vcombine.low %v1633_v3, %v1637_v56  ;;  %v1642_v37 = vcombine.high %v1633_v3, %v1637_v56 }
 0x2fd   : > { %v1975_v63 = vpop.permute.xlu0 %1974 }
 0x2fe   : > { %v3470_v18 = vrot.slane %v1641_v16, %v3097_v36  ;;  %v1656_v1 = vrot.slane %v1642_v37, %v3097_v36 }
 0x2ff   : > { %v1755_v5 = vpop.permute.xlu1 %1754 }
 0x300   : > { %v1759_v23 = vcombine.low %v1751_v4, %v1755_v5  ;;  %v1760_v12 = vcombine.high %v1751_v4, %v1755_v5 }
 0x301   : > { %v2093_v11 = vpop.permute.xlu0 %2092 }
 0x302   : > { %v3481_v32 = vrot.slane %v1759_v23, %v3097_v36  ;;  %v1774_v62 = vrot.slane %v1760_v12, %v3097_v36 }
 0x303   : > { %v1979_v17 = vpop.permute.xlu1 %1978 }
 0x304   : > { %v1983_v25 = vcombine.low %v1975_v63, %v1979_v17  ;;  %v1984_v52 = vcombine.high %v1975_v63, %v1979_v17 }
 0x305   : > { %v1635_v57 = vpop.permute.xlu0 %1634 }
 0x306   : > { %v3473_v22 = vrot.slane %v1635_v57, %v3097_v36  ;;  %v1657_v7 = vcombine.high %v1635_v57, %v2914_v48  ;;  %v3493_v54 = vrot.slane %v1983_v25, %v3097_v36  ;;  %v1998_v13 = vrot.slane %v1984_v52, %v3097_v36 }
 0x307   : > { %v2097_v21 = vpop.permute.xlu1 %2096 }
 0x308   : > { %v1673_v24 = vcombine.high %v3470_v18, %v3473_v22  ;;  %v2101_v38 = vcombine.low %v2093_v11, %v2097_v21  ;;  %v3501_v20 = vrot.slane %v1657_v7, %v3097_v36  ;;  %v2102_v15 = vcombine.high %v2093_v11, %v2097_v21 }
 0x309   : > { %v1977_v26 = vpop.permute.xlu0 %1976 }
 0x30a   : > { %v3478_v28 = vrot.slane %v1673_v24, %v3108_v51  ;;  %v3488_v33 = vrot.slane %v1977_v26, %v3097_v36  ;;  %v3510_v8 = vrot.slane %v2101_v38, %v3097_v36  ;;  %v1999_v46 = vcombine.high %v1977_v26, %v2914_v48 }
 0x30b   : > { %v1753_v29 = vpop.permute.xlu1 %1752  ;;  %v1688_v49 = vcombine.low %v1656_v1, %v3501_v20  ;;  %v2116_v50 = vrot.slane %v2102_v15, %v3097_v36  ;;  %v1689_v7 = vcombine.high %v1656_v1, %v3501_v20 }
 0x30c   : > { %v3485_v9 = vrot.slane %v1753_v29, %v3097_v36  ;;  %1713 = vrot.lane.b32.xlu1 %v3478_v28, %s2927_s9  ;;  %v1775_v39 = vcombine.high %v1753_v29, %v2914_v48  ;;  %v2015_v0 = vcombine.high %v3493_v54, %v3488_v33  ;;  %v2013_v27 = vrot.slane %v1999_v46, %v3097_v36 }
 0x30d   : > { %v3498_v41 = vpop.permute.xlu0 %2316  ;;  %v3546_v4 = vrot.slane %v1688_v49, %v3108_v51 }
 0x30e   : > { %v1791_v40 = vcombine.high %v3481_v32, %v3485_v9  ;;  %v3513_v34 = vrot.slane %v1775_v39, %v3097_v36  ;;  %v3525_v53 = vrot.slane %v2015_v0, %v3108_v51  ;;  %v2030_v56 = vcombine.low %v1998_v13, %v2013_v27 }
 0x30f   : > { %v2095_v19 = vpop.permute.xlu1 %2094 }
 0x310   : > { %v3504_v45 = vrot.slane %v1791_v40, %v3108_v51  ;;  %v2117_v30 = vcombine.high %v2095_v19, %v2914_v48  ;;  %v3518_v42 = vrot.slane %v2095_v19, %v3097_v36  ;;  %v1806_v6 = vcombine.low %v1774_v62, %v3513_v34 }
 0x311   : > { %v2435_v43 = vpop.permute.xlu0 %2434  ;;  %v3576_v25 = vrot.slane %v2030_v56, %v3108_v51  ;;  %v1807_v40 = vcombine.high %v1774_v62, %v3513_v34  ;;  %v2031_v34 = vcombine.high %v1998_v13, %v2013_v27 }
 0x312   : > { %1831 = vrot.lane.b32.xlu0 %v3504_v45, %s2927_s9  ;;  %v2131_v31 = vrot.slane %v2117_v30, %v3097_v36  ;;  %v2133_v35 = vcombine.high %v3510_v8, %v3518_v42  ;;  %v3552_v5 = vrot.slane %v1806_v6, %v3108_v51  ;;  %v3603_v30 = vrot.slane %v1689_v7, %v3108_v51 }
 0x313   : > { %v2321_v14 = vpop.permute.xlu1 %2320  ;;  %v3608_v52 = vrot.slane %v1807_v40, %v3108_v51  ;;  %v3619_v6 = vrot.slane %v2031_v34, %v3108_v51 }
 0x314   : > { %v3534_v58 = vrot.slane %v2133_v35, %v3108_v51  ;;  %v2325_v60 = vcombine.low %v3498_v41, %v2321_v14  ;;  %v2148_v61 = vcombine.low %v2116_v50, %v2131_v31  ;;  %v2326_v12 = vcombine.high %v3498_v41, %v2321_v14 }
 0x315   : > { %v2319_v59 = vpop.permute.xlu0 %2318  ;;  %v2149_v1 = vcombine.high %v2116_v50, %v2131_v31 }
 0x316   : > { %2055 = vrot.lane.b32.xlu0 %v3525_v53, %s2927_s9  ;;  %2173 = vrot.lane.b32.xlu1 %v3534_v58, %s2927_s9  ;;  %v3543_v3 = vrot.slane %v2319_v59, %v3097_v36  ;;  %v3549_v63 = vrot.slane %v2325_v60, %v3097_v36  ;;  %v3569_v23 = vrot.slane %v2148_v61, %v3108_v51 }
 0x317   : > { %v2439_v55 = vpop.permute.xlu1 %2438  ;;  %v2341_v37 = vcombine.high %v2319_v59, %v2914_v48  ;;  %v2340_v41 = vrot.slane %v2326_v12, %v3097_v36  ;;  %v3616_v35 = vrot.slane %v2149_v1, %v3108_v51  ;;  %v1790_v59 = vcombine.low %v3481_v32, %v3485_v9 }
 0x318   : > { %v2443_v2 = vcombine.low %v2435_v43, %v2439_v55  ;;  %v2357_v57 = vcombine.high %v3549_v63, %v3543_v3  ;;  %v2444_v15 = vcombine.high %v2435_v43, %v2439_v55  ;;  %v1672_v55 = vcombine.low %v3470_v18, %v3473_v22 }
 0x319   : > { %v3556_v11 = vpop.permute.xlu0 %1588  ;;  %v2355_v46 = vrot.slane %v2341_v37, %v3097_v36 }
 0x31a   : > { %1721 = vrot.lane.b32.xlu0 %v3546_v4, %s2928_s11  ;;  %v3559_v17 = vrot.slane %v2443_v2, %v3097_v36  ;;  %1839 = vrot.lane.b32.xlu1 %v3552_v5, %s2928_s11  ;;  %v3585_v38 = vrot.slane %v2357_v57, %v3108_v51  ;;  %v2458_v49 = vrot.slane %v2444_v15, %v3097_v36 }
 0x31b   : > { %v2437_v16 = vpop.permute.xlu1 %2436  ;;  %v2372_v31 = vcombine.low %v2340_v41, %v2355_v46  ;;  %v2014_v57 = vcombine.low %v3493_v54, %v3488_v33  ;;  %v3650_v22 = vrot.slane %v1672_v55, %v3108_v51 }
 0x31c   : > { %v3566_v21 = vrot.slane %v2437_v16, %v3097_v36  ;;  %v2459_v19 = vcombine.high %v2437_v16, %v2914_v48  ;;  %v3640_v16 = vrot.slane %v1790_v59, %v3108_v51  ;;  %v2356_v59 = vcombine.low %v3549_v63, %v3543_v3 }
 0x31d   : > { %v3578_v26 = vpop.permute.xlu0 %1945  ;;  %v3628_v13 = vrot.slane %v2372_v31, %v3108_v51  ;;  %v3663_v40 = vrot.slane %v2014_v57, %v3108_v51  ;;  %v1704_v12 = vcombine.high %v3650_v22, %v2914_v48  ;;  %v2165_v63 = vcombine.high %v3534_v58, %v2914_v48 }
 0x31e   : > { %v2475_v24 = vcombine.high %v3559_v17, %v3566_v21  ;;  %2181 = vrot.lane.b32.xlu0 %v3569_v23, %s2928_s11  ;;  %2063 = vrot.lane.b32.xlu1 %v3576_v25, %s2928_s11  ;;  %v2473_v62 = vrot.slane %v2459_v19, %v3097_v36  ;;  %v2373_v36 = vcombine.high %v2340_v41, %v2355_v46 }
 0x31f   : > { %v3580_v29 = vpop.permute.xlu1 %1937  ;;  %v3716_v3 = vrot.slane %v2356_v59, %v3108_v51 }
 0x320   : > { %v3588_v39 = vrot.slane %v2475_v24, %v3108_v51  ;;  %v2490_v50 = vcombine.low %v2458_v49, %v2473_v62  ;;  %v2491_v61 = vcombine.high %v2458_v49, %v2473_v62  ;;  %v3647_v18 = vrot.slane %v2373_v36, %v3108_v51 }
 0x321   : > { %v3597_v20 = vpop.permute.xlu0 %1953  ;;  %v2388_v58 = vcombine.high %v3716_v3, %v2914_v48 }
 0x322   : > { %2397 = vrot.lane.b32.xlu0 %v3585_v38, %s2927_s9  ;;  %2515 = vrot.lane.b32.xlu1 %v3588_v39, %s2927_s9  ;;  %v3633_v2 = vrot.slane %v2490_v50, %v3108_v51  ;;  %v3657_v7 = vrot.slane %v2491_v61, %v3108_v51  ;;  %s2756_s9 = sshll.u32 (%p3005_p6), %s2899_s15, 2 }
 0x323   : > { %v1597_v0 = vpop.permute.xlu1 %1596  ;;  %s2635_s12 = sadd.s32 (%p3005_p6), %s2895_s14, %s2756_s9 }
 0x324   : > { %s2757_s10 = sshll.u32 (%p3005_p6), %s2635_s12, 3 }
 0x325   : > { %v1585_v43 = vpop.permute.xlu0 %1584 }
 0x326   : > { %1729 = vrot.lane.b32.xlu0 %v3603_v30, %s2929_s21  ;;  %1847 = vrot.lane.b32.xlu1 %v3608_v52, %s2929_s21  ;;  %v1612_v32 = vsel %vm1611_vm15, %v3420_v44, %v1585_v43  ;;  %v2132_v44 = vcombine.low %v3510_v8, %v3518_v42  ;;  %v1822_v8 = vcombine.high %v3640_v16, %v2914_v48 }
 0x327   : > { %v2280_v14 = vpop.permute.xlu1 %2279  ;;  %v1614_v24 = vsel %vm1613_vm0, %v1612_v32, %v3556_v11 }
 0x328   : > { %v3670_v42 = vrot.slane %v2132_v44, %v3108_v51 }
 0x329   : > { %v1593_v27 = vpop.permute.xlu0 %1592 }
 0x32a   : > { %2189 = vrot.lane.b32.xlu0 %v3616_v35, %s2929_s21  ;;  %2071 = vrot.lane.b32.xlu1 %v3619_v6, %s2929_s21  ;;  %v1616_v54 = vsel %vm1615_vm1, %v1614_v24, %v1593_v27  ;;  %v2164_v62 = vcombine.high %v3670_v42, %v2914_v48  ;;  %v2474_v27 = vcombine.low %v3559_v17, %v3566_v21 }
 0x32b   : > { %v1605_v60 = vpop.permute.xlu1 %1604  ;;  %v1618_v11 = vsel %vm1617_vm2, %v1616_v54, %v1597_v0  ;;  %v2046_v0 = vcombine.high %v3663_v40, %v2914_v48  ;;  %v1706_v24 = vcombine.high %v3546_v4, %v2914_v48  ;;  %v2166_v54 = vcombine.high %v3569_v23, %v2914_v48 }
 0x32c   : > { %v2389_v4 = vcombine.high %v3585_v38, %v2914_v48  ;;  %v1707_v23 = vcombine.high %v3603_v30, %v2914_v48  ;;  %v2167_v38 = vcombine.high %v3616_v35, %v2914_v48  ;;  %v2390_v30 = vcombine.high %v3628_v13, %v2914_v48 }
 0x32d   : > { %v2276_v56 = vpop.permute.xlu0 %2275  ;;  %v2391_v35 = vcombine.high %v3647_v18, %v2914_v48 }
 0x32e   : > { %2405 = vrot.lane.b32.xlu0 %v3628_v13, %s2928_s11  ;;  %2523 = vrot.lane.b32.xlu1 %v3633_v2, %s2928_s11  ;;  %v2302_v1 = vsel %vm1611_vm15, %v3435_v47, %v2276_v56  ;;  %v3709_v56 = vrot.slane %v2474_v27, %v3108_v51  ;;  %v2555_v13 = vld [vmem:[%s3875_s2 + $0x8] sm:$0xff] }
 0x32f   : > { %v2288_v9 = vpop.permute.xlu1 %2287  ;;  %v2303_v41 = vsel %vm1613_vm0, %v2302_v1, %v2280_v14 }
 0x330   : > { %v2506_v51 = vcombine.high %v3709_v56, %v2914_v48 }
 0x331   : > { %v1601_v33 = vpop.permute.xlu0 %1600 }
 0x332   : > { %2413 = vrot.lane.b32.xlu0 %v3647_v18, %s2929_s21  ;;  %2531 = vrot.lane.b32.xlu1 %v3657_v7, %s2929_s21  ;;  %v1620_v15 = vsel %vm1619_vm3, %v1618_v11, %v1601_v33  ;;  %v2048_v33 = vcombine.high %v3576_v25, %v2914_v48  ;;  %v1825_v25 = vcombine.high %v3608_v52, %v2914_v48 }
 0x333   : > { %v2296_v37 = vpop.permute.xlu1 %2295  ;;  %v1622_v47 = vsel %vm1621_vm4, %v1620_v15, %v1605_v60  ;;  %v1823_v60 = vcombine.high %v3504_v45, %v2914_v48  ;;  %v2508_v52 = vcombine.high %v3633_v2, %v2914_v48  ;;  %v2554_v2 = vld [vmem:[%s3875_s2] sm:$0xff] }
 0x335   : > { %v2284_v19 = vpop.permute.xlu0 %2283 }
 0x336   : > { %1827 = vrot.lane.b32.xlu0 %v1822_v8, %s2930_s22  ;;  %1709 = vrot.lane.b32.xlu1 %v1704_v12, %s2930_s22  ;;  %v2304_v49 = vsel %vm1615_vm1, %v2303_v41, %v2284_v19 }
 0x337   : > { %v1934_v46 = vpop.permute.xlu1 %1933  ;;  %v2305_v36 = vsel %vm1617_vm2, %v2304_v49, %v2288_v9 }
 0x338   : > { %v1960_v34 = vsel %vm1611_vm15, %v3448_v10, %v1934_v46 }
 0x339   : > { %v1609_v43 = vpop.permute.xlu0 %1608  ;;  %v1961_v31 = vsel %vm1613_vm0, %v1960_v34, %v3580_v29  ;;  %v1705_v29 = vcombine.high %v3478_v28, %v2914_v48  ;;  %v2047_v28 = vcombine.high %v3525_v53, %v2914_v48 }
 0x33a   : > { %2051 = vrot.lane.b32.xlu0 %v2046_v0, %s2930_s22  ;;  %v1624_v50 = vsel %vm1623_vm5, %v1622_v47, %v1609_v43  ;;  %2169 = vrot.lane.b32.xlu1 %v2164_v62, %s2930_s22 }
 0x33b   : > { %v1942_v10 = vpop.permute.xlu1 %1941  ;;  %1625 = vst [vmem:[#allocation3] sm:$0x7] %v1624_v50 }
 0x33c   : > { %v1962_v14 = vsel %vm1615_vm1, %v1961_v31, %v1942_v10 }
 0x33d   : > { %v2292_v55 = vpop.permute.xlu0 %2291  ;;  %v1963_v21 = vsel %vm1617_vm2, %v1962_v14, %v3578_v26 }
 0x33e   : > { %1835 = vrot.lane.b32.xlu0 %v1823_v60, %s2931_s24  ;;  %v2306_v61 = vsel %vm1619_vm3, %v2305_v36, %v2292_v55  ;;  %1717 = vrot.lane.b32.xlu1 %v1705_v29, %s2931_s24 }
 0x33f   : > { %v1950_v17 = vpop.permute.xlu1 %1949  ;;  %v2307_v26 = vsel %vm1621_vm4, %v2306_v61, %v2296_v37  ;;  %v2935_v37 = vmov 0  }
 0x340   : > { %v1964_v45 = vsel %vm1619_vm3, %v1963_v21, %v1950_v17  ;;  %2854 = vset.pattern.permute.xlu1 %v2935_v37  ;;  %2855 = vset.pattern.permute.xlu0 %v2935_v37 }
 0x341   : > { %v2300_v32 = vpop.permute.xlu0 %2299  ;;  %v1965_v57 = vsel %vm1621_vm4, %v1964_v45, %v3597_v20  ;;  %v1824_v20 = vcombine.high %v3552_v5, %v2914_v48  ;;  %v2507_v5 = vcombine.high %v3588_v39, %v2914_v48  ;;  %v2049_v39 = vcombine.high %v3619_v6, %v2914_v48 }
 0x342   : > { %2059 = vrot.lane.b32.xlu0 %v2047_v28, %s2931_s24  ;;  %v2308_v44 = vsel %vm1623_vm5, %v2307_v26, %v2300_v32  ;;  %2177 = vrot.lane.b32.xlu1 %v2165_v63, %s2931_s24  ;;  %v2509_v6 = vcombine.high %v3657_v7, %v2914_v48 }
 0x343   : > { %v1958_v9 = vpop.permute.xlu1 %1957  ;;  %2309 = vst [vmem:[#allocation3 + $0x12] sm:$0x7] %v2308_v44 }
 0x344   : > { %v1966_v53 = vsel %vm1623_vm5, %v1965_v57, %v1958_v9 }
 0x345   : > { %1967 = vst [vmem:[#allocation3 + $0x9] sm:$0x7] %v1966_v53 }
 0x346   : > { %2511 = vrot.lane.b32.xlu0 %v2506_v51, %s2930_s22  ;;  %2393 = vrot.lane.b32.xlu1 %v2388_v58, %s2930_s22  ;;  %s2637_s22 = scalar_lea.vmem (%p3005_p6), %s3876_s3, %s2757_s10 }
 0x34a   : > { %1843 = vrot.lane.b32.xlu0 %v1824_v20, %s2932_s25  ;;  %1725 = vrot.lane.b32.xlu1 %v1706_v24, %s2932_s25 }
 0x34e   : > { %2067 = vrot.lane.b32.xlu0 %v2048_v33, %s2932_s25  ;;  %2185 = vrot.lane.b32.xlu1 %v2166_v54, %s2932_s25 }
 0x352   : > { %2519 = vrot.lane.b32.xlu0 %v2507_v5, %s2931_s24  ;;  %2401 = vrot.lane.b32.xlu1 %v2389_v4, %s2931_s24 }
 0x356   : > { %1851 = vrot.lane.b32.xlu0 %v1825_v25, %s2933_s26  ;;  %1733 = vrot.lane.b32.xlu1 %v1707_v23, %s2933_s26 }
 0x35a   : > { %2075 = vrot.lane.b32.xlu0 %v2049_v39, %s2933_s26  ;;  %2193 = vrot.lane.b32.xlu1 %v2167_v38, %s2933_s26 }
 0x35e   : > { %2527 = vrot.lane.b32.xlu0 %v2508_v52, %s2932_s25  ;;  %2409 = vrot.lane.b32.xlu1 %v2390_v30, %s2932_s25 }
 0x362   : > { %2535 = vrot.lane.b32.xlu0 %v2509_v6, %s2933_s26  ;;  %2417 = vrot.lane.b32.xlu1 %v2391_v35, %s2933_s26 }
 0x366   : > { %2558 = vperm.xlu1 %2854, %v2554_v2   ;;  %2563 = vperm.xlu0 %2855, %v2555_v13  }
 0x37e   : > { %v1714_v18 = vpop.permute.xlu1 %1713 }
 0x384   : > { %v1832_v7 = vpop.permute.xlu0 %1831 }
 0x388   : > { %v2056_v8 = vpop.permute.xlu0 %2055  ;;  %v2174_v11 = vpop.permute.xlu1 %2173 }
 0x38c   : > { %v1722_v12 = vpop.permute.xlu0 %1721  ;;  %v1840_v19 = vpop.permute.xlu1 %1839 }
 0x390   : > { %v2182_v1 = vpop.permute.xlu0 %2181  ;;  %v2064_v15 = vpop.permute.xlu1 %2063 }
 0x394   : > { %v2398_v46 = vpop.permute.xlu0 %2397  ;;  %v2516_v34 = vpop.permute.xlu1 %2515 }
 0x398   : > { %v1730_v0 = vpop.permute.xlu0 %1729  ;;  %v1848_v41 = vpop.permute.xlu1 %1847 }
 0x39c   : > { %v2190_v62 = vpop.permute.xlu0 %2189  ;;  %v2072_v47 = vpop.permute.xlu1 %2071 }
 0x3a0   : > { %v3782_v43 = vpop.permute.xlu0 %2405  ;;  %v2524_v49 = vpop.permute.xlu1 %2523 }
 0x3a4   : > { %v3784_v31 = vpop.permute.xlu0 %2413  ;;  %v3786_v10 = vpop.permute.xlu1 %2531 }
 0x3a8   : > { %v1828_v50 = vpop.permute.xlu0 %1827  ;;  %v1710_v27 = vpop.permute.xlu1 %1709 }
 0x3a9   : > { %v1854_v45 = vsel %vm1611_vm15, %v3640_v16, %v1828_v50  ;;  %v1736_v63 = vsel %vm1611_vm15, %v3650_v22, %v1710_v27 }
 0x3aa   : > { %v1855_v26 = vsel %vm1613_vm0, %v1854_v45, %v1832_v7  ;;  %v1737_v44 = vsel %vm1613_vm0, %v1736_v63, %v1714_v18  ;;  %v2856_v63 = vld [vmem:[%s3874_s1] sm:$0xff]  }
 0x3ac   : > { %v2052_v14 = vpop.permute.xlu0 %2051  ;;  %v2170_v60 = vpop.permute.xlu1 %2169 }
 0x3ad   : > { %v2078_v9 = vsel %vm1611_vm15, %v3663_v40, %v2052_v14  ;;  %v2196_v51 = vsel %vm1611_vm15, %v3670_v42, %v2170_v60 }
 0x3ae   : > { %v2079_v58 = vsel %vm1613_vm0, %v2078_v9, %v2056_v8  ;;  %v2197_v40 = vsel %vm1613_vm0, %v2196_v51, %v2174_v11 }
 0x3b0   : > { %v1836_v59 = vpop.permute.xlu0 %1835  ;;  %v1718_v29 = vpop.permute.xlu1 %1717 }
 0x3b1   : > { %v1856_v57 = vsel %vm1615_vm1, %v1855_v26, %v1836_v59  ;;  %v1738_v16 = vsel %vm1615_vm1, %v1737_v44, %v1718_v29 }
 0x3b2   : > { %v1857_v22 = vsel %vm1617_vm2, %v1856_v57, %v1840_v19  ;;  %v1739_v54 = vsel %vm1617_vm2, %v1738_v16, %v1722_v12 }
 0x3b4   : > { %v2060_v36 = vpop.permute.xlu0 %2059  ;;  %v2178_v55 = vpop.permute.xlu1 %2177 }
 0x3b5   : > { %v2080_v24 = vsel %vm1615_vm1, %v2079_v58, %v2060_v36  ;;  %v2198_v4 = vsel %vm1615_vm1, %v2197_v40, %v2178_v55 }
 0x3b6   : > { %v2081_v25 = vsel %vm1617_vm2, %v2080_v24, %v2064_v15  ;;  %v2199_v6 = vsel %vm1617_vm2, %v2198_v4, %v2182_v1 }
 0x3b8   : > { %v2512_v17 = vpop.permute.xlu0 %2511  ;;  %v2394_v21 = vpop.permute.xlu1 %2393 }
 0x3b9   : > { %v2538_v38 = vsel %vm1611_vm15, %v3709_v56, %v2512_v17  ;;  %v2420_v13 = vsel %vm1611_vm15, %v3716_v3, %v2394_v21 }
 0x3ba   : > { %v2539_v18 = vsel %vm1613_vm0, %v2538_v38, %v2516_v34  ;;  %v2421_v19 = vsel %vm1613_vm0, %v2420_v13, %v2398_v46 }
 0x3bc   : > { %v1844_v61 = vpop.permute.xlu0 %1843  ;;  %v1726_v28 = vpop.permute.xlu1 %1725 }
 0x3bd   : > { %v1858_v33 = vsel %vm1619_vm3, %v1857_v22, %v1844_v61  ;;  %v1740_v42 = vsel %vm1619_vm3, %v1739_v54, %v1726_v28 }
 0x3be   : > { %v1859_v23 = vsel %vm1621_vm4, %v1858_v33, %v1848_v41  ;;  %v1741_v2 = vsel %vm1621_vm4, %v1740_v42, %v1730_v0 }
 0x3c0   : > { %v2068_v32 = vpop.permute.xlu0 %2067  ;;  %v2186_v53 = vpop.permute.xlu1 %2185 }
 0x3c1   : > { %v2082_v52 = vsel %vm1619_vm3, %v2081_v25, %v2068_v32  ;;  %v2200_v37 = vsel %vm1619_vm3, %v2199_v6, %v2186_v53 }
 0x3c2   : > { %v2083_v56 = vsel %vm1621_vm4, %v2082_v52, %v2072_v47  ;;  %v2201_v15 = vsel %vm1621_vm4, %v2200_v37, %v2190_v62 }
 0x3c4   : > { %v2520_v20 = vpop.permute.xlu0 %2519  ;;  %v2402_v5 = vpop.permute.xlu1 %2401 }
 0x3c5   : > { %v2540_v11 = vsel %vm1615_vm1, %v2539_v18, %v2520_v20  ;;  %v2422_v3 = vsel %vm1615_vm1, %v2421_v19, %v2402_v5 }
 0x3c6   : > { %v2541_v34 = vsel %vm1617_vm2, %v2540_v11, %v2524_v49  ;;  %v2423_v27 = vsel %vm1617_vm2, %v2422_v3, %v3782_v43  ;;  %v2936_v43 = vmov 65535  }
 0x3c8   : > { %v1852_v39 = vpop.permute.xlu0 %1851  ;;  %v1734_v35 = vpop.permute.xlu1 %1733 }
 0x3c9   : > { %v1860_v30 = vsel %vm1623_vm5, %v1859_v23, %v1852_v39  ;;  %v1742_v7 = vsel %vm1623_vm5, %v1741_v2, %v1734_v35 }
 0x3ca   : > { %1861 = vst [vmem:[#allocation3 + $0x6] sm:$0x7] %v1860_v30  ;;  %1743 = vst [vmem:[#allocation3 + $0x3] sm:$0x7] %v1742_v7 }
 0x3cc   : > { %v2076_v8 = vpop.permute.xlu0 %2075  ;;  %v2194_v1 = vpop.permute.xlu1 %2193 }
 0x3cd   : > { %v2084_v12 = vsel %vm1623_vm5, %v2083_v56, %v2076_v8  ;;  %v2202_v0 = vsel %vm1623_vm5, %v2201_v15, %v2194_v1 }
 0x3ce   : > { %2085 = vst [vmem:[#allocation3 + $0xc] sm:$0x7] %v2084_v12  ;;  %2203 = vst [vmem:[#allocation3 + $0xf] sm:$0x7] %v2202_v0 }
 0x3d0   : > { %v2528_v41 = vpop.permute.xlu0 %2527  ;;  %v2410_v50 = vpop.permute.xlu1 %2409 }
 0x3d1   : > { %v2542_v47 = vsel %vm1619_vm3, %v2541_v34, %v2528_v41  ;;  %v2424_v46 = vsel %vm1619_vm3, %v2423_v27, %v2410_v50  ;;  %v2548_v36 = vld [vmem:[#allocation3] sm:$0xff] }
 0x3d2   : > { %v2543_v62 = vsel %vm1621_vm4, %v2542_v47, %v3786_v10  ;;  %v2425_v29 = vsel %vm1621_vm4, %v2424_v46, %v3784_v31  ;;  %v2577_v10 = vsel %vm2575_vm7, 4294967295, %v2936_v43 }
 0x3d3   : > { %v2578_v45 = vsel %vm2576_vm8, %v2577_v10, 0 }
 0x3d4   : > { %v2536_v14 = vpop.permute.xlu0 %2535  ;;  %v2418_v59 = vpop.permute.xlu1 %2417 }
 0x3d5   : > { %v2544_v60 = vsel %vm1623_vm5, %v2543_v62, %v2536_v14  ;;  %v2426_v49 = vsel %vm1623_vm5, %v2425_v29, %v2418_v59  ;;  %v2549_v55 = vld [vmem:[#allocation3 + $0x8] sm:$0xff] }
 0x3d6   : > { %2545 = vst [vmem:[#allocation3 + $0x18] sm:$0x7] %v2544_v60  ;;  %2427 = vst [vmem:[#allocation3 + $0x15] sm:$0x7] %v2426_v49  ;;  %v2552_v17 = vpack.c.bf16 %v2549_v55, %v2548_v36 }
 0x3d8   : > { %2764 = vmatpush3.bf16.msra.mxu0 %v2552_v17 }
 0x3d9   : > { %2765 = vmatprep.subr.bf16.mxu0 %v2914_v48 }
 0x3dd   : > { %v2551_v21 = vld [vmem:[#allocation3 + $0x18] sm:$0x7]  ;;  %v2550_v61 = vld [vmem:[#allocation3 + $0x10] sm:$0xff] }
 0x3de   : > { %v2553_v28 = vpack.c.bf16 %v2551_v21, %v2550_v61 }
 0x3e0   : > { %v2580_v31 = vand.u32 %v2578_v45, %v2553_v28 }
 0x3e2   : > { %2766 = vmatpush3.bf16.msra.mxu0 %v2580_v31 }
 0x3e5   : > { %2768 = vmatmul.mubr.msk.bf16.vlgmr.msra.gmra.mrb[0].mxu0 %vm2571_vm9, %v2856_v63  ;;  %v2559_v26 = vpop.permute.xlu1 %2558  ;;  %v2564_v48 = vpop.permute.xlu0 %2563 }
 0x4b8   : > { %v2616_v32 = vpop.f32.mrb[0].mxu0 }
 0x4b9   : > { %v2617_v9 = vadd.f32 %v2616_v32, %v2559_v26  ;;  %v2769_v57 = vpop.f32.mrb[1].mxu0  ;;  %2633 = sbr.rel (!%p3005_p6) target bundleno = 1224 (0x4c8), region = 74 }
 0x4ba   : > { %v2619_v44 = vpop.f32.mrb[2].mxu0 }
 0x4bb   : > { %v2623_v53 = vmax.f32 %v2617_v9, 0.0  ;;  %v2620_v51 = vadd.f32 %v2619_v44, %v2564_v48  ;;  %v2770_v16 = vpop.f32.mrb[3].mxu0 }
 0x4bd   : > { %2625 = vst [vmem:[%s224_s8] sm:$0xff] %v2623_v53  ;;  %v2624_v58 = vmax.f32 %v2620_v51, 0.0 }
 0x4bf   : > { %2626 = vst [vmem:[%s224_s8 + $0x8] sm:$0xff] %v2624_v58 }
 0x4c4   : > { %v2667_v22 = vld [vmem:[%s224_s8] sm:$0xff] }
 0x4c5   : > { %2668 = vst [vmem:[%s2637_s22] sm:$0xff] %v2667_v22 }
 0x4c6   : > { %v2669_v20 = vld [vmem:[%s224_s8 + $0x8] sm:$0xff] }
 0x4c7   : > { %2670 = vst [vmem:[%s2637_s22 + $0x10] sm:$0xff] %v2669_v20 }
 0x4c8 PF: > { %s13_s18 = sadd.s32 1, %s2911_s18   ;;  %s3878_s12 = smov %s2891_s13 }
 0x4c9   : > { %p10_p0 = scmp.ge.s32.totalorder %s13_s18, 6   ;;  %s3879_s13 = smov %s3013_s27 }
 0x4ca   : > { %s3880_s14 = smov %s2903_s16  ;;  %s3881_s15 = smov %s2907_s17 }
 0x4cb   : > { %s3882_s16 = smov %s3885_s19  ;;  %s3883_s17 = smov %s3889_s20 }
 0x4cc   :  { %12 = sbr.rel (!%p10_p0) target bundleno = 4 (0x4), region = 143 }

</bundles_post_ra>
